<compile_context>
chip_gen: v6e
topology: v6e:2x2x1
jax: 0.10.0
libtpu: 0.0.40
codegen_flags: <defaults>
</compile_context>

<pallas_src>
import functools

import jax
import jax.numpy as jnp
from jax.experimental import pallas as pl
from jax.experimental.pallas import tpu as pltpu


# ---------------------------------------------------------------------------
# Fused Pallas kernel: encoder(pre) / encoder(post) / dec1 3x3 / dec2 1x1
# Activation layout inside the kernel: (C, H*W), H*W on lanes (lane-dense).
# ---------------------------------------------------------------------------
def _fused_kernel(pre_ref, post_ref,
                  w_enc_ref, b_enc_ref,
                  w_d1_pre_ref, w_d1_post_ref, b_d1_ref,
                  w_d2_ref, b_d2_ref,
                  out_ref,
                  *, H, W, HID):
    f32 = jnp.float32
    HW = H * W
    PAD = W + 1  # row halo (+1 guard lane so every tap window stays in bounds)

    # Column-validity masks, computed once and reused by every conv tap.
    col = jax.lax.broadcasted_iota(jnp.int32, (1, HW), 1) % W
    col_ok = {-1: col >= 1, 0: None, 1: col <= W - 2}

    def rowpad(x):
        # Zero rows above/below the image in value space (no scratch, no ring
        # re-zeroing): x (C, HW) -> (C, HW + 2*(W+1)).
        z = jnp.zeros((x.shape[0], PAD), x.dtype)
        return jnp.concatenate([z, x, z], axis=1)

    def conv3x3(acc, xp, w, cout):
        # 9 accumulating tap matmuls (transposed conv): no im2col, no lane-axis
        # concat of tiny channel slices.  Row shifts come from the zero row pad,
        # column wrap is killed by a static border mask.
        for kh in range(3):
            for kw in range(3):
                dh, dw = kh - 1, kw - 1
                off = PAD + dh * W + dw
                win = xp[:, off:off + HW]                     # (Cin, HW)
                if col_ok[dw] is not None:
                    win = jnp.where(col_ok[dw], win, jnp.zeros_like(win))
                w_tap = w[(kh * 3 + kw) * cout:(kh * 3 + kw + 1) * cout, :]
                acc = acc + jnp.dot(w_tap, win, preferred_element_type=f32)
        return acc

    # ---- hoist weight/bias loads (one VMEM load per matrix) ----
    w_enc = w_enc_ref[...]
    b_enc = b_enc_ref[...]
    w_d1_pre = w_d1_pre_ref[...]
    w_d1_post = w_d1_post_ref[...]

    # ---- shared encoder conv3x3 + ReLU on pre and post ----
    feats = []
    for src_ref in (pre_ref, post_ref):
        xp = rowpad(src_ref[...])                             # (Cin, HW+2PAD) bf16
        acc = conv3x3(jnp.zeros((HID, HW), f32), xp, w_enc, HID)
        feats.append(jnp.maximum(acc + b_enc, 0.0).astype(jnp.bfloat16))
    f_pre, f_post = feats                                     # (HID, HW) bf16 each

    # ---- DecoderV1 conv3x3 over channel-concat(f_pre, f_post); the concat is
    # never materialized: dec1 weights are split and both halves accumulate. ----
    acc = conv3x3(jnp.zeros((HID, HW), f32), rowpad(f_pre), w_d1_pre, HID)
    acc = conv3x3(acc, rowpad(f_post), w_d1_post, HID)
    h = jnp.maximum(acc + b_d1_ref[...], 0.0).astype(jnp.bfloat16)   # (HID, HW)

    # ---- fused 1x1 classifier: class dim padded on sublanes (5->8), HW lanes
    # dense -> single unmasked f32 store of the only HBM output. ----
    out_ref[...] = (jnp.dot(w_d2_ref[...], h, preferred_element_type=f32)
                    + b_d2_ref[...])                          # (NCP, HW) f32


# ---------------------------------------------------------------------------
# Parameters + forward
# ---------------------------------------------------------------------------
def init_params(key, *, in_ch, hidden, num_classes):
    def conv_init(k, cout, cin, ksz):
        fan_in = cin * ksz * ksz
        w = jax.random.normal(k, (cout, cin, ksz, ksz), jnp.float32) / jnp.sqrt(fan_in)
        b = jnp.zeros((cout,), jnp.float32)
        return w, b

    k1, k2, k3 = jax.random.split(key, 3)
    enc_w, enc_b = conv_init(k1, hidden, in_ch, 3)           # shared encoder conv
    dec1_w, dec1_b = conv_init(k2, hidden, 2 * hidden, 3)    # DecoderV1 conv 3x3
    dec2_w, dec2_b = conv_init(k3, num_classes, hidden, 1)   # DecoderV1 conv 1x1
    return dict(enc_w=enc_w, enc_b=enc_b,
                dec1_w=dec1_w, dec1_b=dec1_b,
                dec2_w=dec2_w, dec2_b=dec2_b)


def disaster_sam_v1(params, pre_nchw, post_nchw):
    B, Cin, H, W = pre_nchw.shape
    HW = H * W
    HID = params["enc_w"].shape[0]
    NC = params["dec2_w"].shape[0]
    NCP = ((NC + 7) // 8) * 8                                 # class dim -> sublane multiple

    # NCHW -> (B, C, H*W): plain reshape (no transpose), bf16 activations for MXU.
    pre = pre_nchw.reshape(B, Cin, HW).astype(jnp.bfloat16)
    post = post_nchw.reshape(B, Cin, HW).astype(jnp.bfloat16)

    # Frozen encoder => stop_gradient on its weights (forward semantics unchanged).
    enc_w = jax.lax.stop_gradient(params["enc_w"])
    enc_b = jax.lax.stop_gradient(params["enc_b"])

    def tap_stack(w_oikk):
        # (Cout, Cin, 3, 3) -> (9*Cout, Cin); row block t = kh*3+kw holds the
        # (Cout, Cin) matrix of tap (kh, kw) used by the transposed tap matmuls.
        Cout, Ci, K, _ = w_oikk.shape
        return jnp.transpose(w_oikk, (2, 3, 0, 1)).reshape(K * K * Cout, Ci)

    w_enc = tap_stack(enc_w).astype(jnp.bfloat16)             # (9*HID, Cin)
    b_enc = enc_b.reshape(HID, 1).astype(jnp.float32)
    d1 = params["dec1_w"]                                     # (HID, 2*HID, 3, 3)
    w_d1_pre = tap_stack(d1[:, :HID]).astype(jnp.bfloat16)    # (9*HID, HID)
    w_d1_post = tap_stack(d1[:, HID:]).astype(jnp.bfloat16)   # (9*HID, HID)
    b_d1 = params["dec1_b"].reshape(HID, 1).astype(jnp.float32)
    w_d2 = params["dec2_w"][:, :, 0, 0]                       # (NC, HID)
    w_d2 = jnp.pad(w_d2, ((0, NCP - NC), (0, 0))).astype(jnp.bfloat16)   # (NCP, HID)
    b_d2 = jnp.pad(params["dec2_b"], (0, NCP - NC)).reshape(NCP, 1).astype(jnp.float32)

    kernel = functools.partial(_fused_kernel, H=H, W=W, HID=HID)
    resident = lambda b: (0, 0)   # weights/biases (all 2D): same block every step

    out = pl.pallas_call(
        kernel,
        out_shape=jax.ShapeDtypeStruct((B, NCP, HW), jnp.float32),
        grid=(B,),
        in_specs=[
            pl.BlockSpec((None, Cin, HW), lambda b: (b, 0, 0)),   # pre
            pl.BlockSpec((None, Cin, HW), lambda b: (b, 0, 0)),   # post
            pl.BlockSpec(w_enc.shape, resident),
            pl.BlockSpec(b_enc.shape, resident),
            pl.BlockSpec(w_d1_pre.shape, resident),
            pl.BlockSpec(w_d1_post.shape, resident),
            pl.BlockSpec(b_d1.shape, resident),
            pl.BlockSpec(w_d2.shape, resident),
            pl.BlockSpec(b_d2.shape, resident),
        ],
        out_specs=pl.BlockSpec((None, NCP, HW), lambda b: (b, 0, 0)),
        compiler_params=pltpu.CompilerParams(
            dimension_semantics=("parallel",),
            vmem_limit_bytes=32 * 1024 * 1024,   # actual usage ~tens of KiB; well under v7x's 64 MiB
        ),
    )(pre, post, w_enc, b_enc, w_d1_pre, w_d1_post, b_d1, w_d2, b_d2)

    # Strip the sublane class pad; (B, NC, H*W) reshapes straight to NCHW logits.
    return out[:, :NC, :].reshape(B, NC, H, W)


# ---------------------------------------------------------------------------
# Reference (plain-JAX conv, same bf16-in / f32-accumulate precision choices)
# ---------------------------------------------------------------------------
def _ref_conv2d(x_nhwc, w_oihw, b, *, padding, relu):
    w_hwio = jnp.transpose(w_oihw, (2, 3, 1, 0)).astype(jnp.bfloat16)
    y = jax.lax.conv_general_dilated(
        x_nhwc.astype(jnp.bfloat16), w_hwio, window_strides=(1, 1),
        padding=[(padding, padding), (padding, padding)],
        dimension_numbers=("NHWC", "HWIO", "NHWC"),
        preferred_element_type=jnp.float32)
    y = y + b[None, None, None, :].astype(jnp.float32)
    return jnp.maximum(y, 0.0) if relu else y


def _ref_forward(params, pre_nchw, post_nchw):
    pre = jnp.transpose(pre_nchw, (0, 2, 3, 1))
    post = jnp.transpose(post_nchw, (0, 2, 3, 1))
    f_pre = _ref_conv2d(pre, params["enc_w"], params["enc_b"],
                        padding=1, relu=True).astype(jnp.bfloat16)
    f_post = _ref_conv2d(post, params["enc_w"], params["enc_b"],
                         padding=1, relu=True).astype(jnp.bfloat16)
    x = jnp.concatenate([f_pre, f_post], axis=-1)
    x = _ref_conv2d(x, params["dec1_w"], params["dec1_b"],
                    padding=1, relu=True).astype(jnp.bfloat16)
    x = _ref_conv2d(x, params["dec2_w"], params["dec2_b"], padding=0, relu=False)
    return jnp.transpose(x, (0, 3, 1, 2))


if __name__ == "__main__":
    B, C_IN, H, W = 2, 3, 16, 16
    HIDDEN, NUM_CLASSES = 8, 5

    key = jax.random.PRNGKey(0)
    k_pre, k_post, k_param = jax.random.split(key, 3)
    pre = jax.random.normal(k_pre, (B, C_IN, H, W), jnp.float32)
    post = jax.random.normal(k_post, (B, C_IN, H, W), jnp.float32)
    params = init_params(k_param, in_ch=C_IN, hidden=HIDDEN, num_classes=NUM_CLASSES)

    out = jax.jit(disaster_sam_v1)(params, pre, post)
    out = jax.block_until_ready(out)
    assert out.shape == (B, NUM_CLASSES, H, W), out.shape

    ref = _ref_forward(params, pre, post)
    err = float(jnp.max(jnp.abs(out - ref)))
    assert jnp.allclose(out, ref, rtol=1e-2, atol=1e-2), err

    print("KERNEL_OK")
</pallas_src>

<mosaic_0001>
module attributes {stable_mosaic.version = 11 : i64} {
  func.func @_fused_kernel(%arg0: i32, %arg1: memref<1x3x256xbf16, #tpu.memory_space<vmem>>, %arg2: memref<1x3x256xbf16, #tpu.memory_space<vmem>>, %arg3: memref<72x3xbf16, #tpu.memory_space<vmem>>, %arg4: memref<8x1xf32, #tpu.memory_space<vmem>>, %arg5: memref<72x8xbf16, #tpu.memory_space<vmem>>, %arg6: memref<72x8xbf16, #tpu.memory_space<vmem>>, %arg7: memref<8x1xf32, #tpu.memory_space<vmem>>, %arg8: memref<8x8xbf16, #tpu.memory_space<vmem>>, %arg9: memref<8x1xf32, #tpu.memory_space<vmem>>, %arg10: memref<1x8x256xf32, #tpu.memory_space<vmem>>) attributes {dimension_semantics = [#tpu.dimension_semantics<parallel>], iteration_bounds = array<i64: 2>, scalar_prefetch = 0 : i64, scratch_operands = 0 : i64, tpu.core_type = #tpu.core_type<tc>, window_params = [{transform_indices = @transform_0, window_bounds = array<i64: 1, 3, 256>}, {transform_indices = @transform_1, window_bounds = array<i64: 1, 3, 256>}, {pipeline_mode = #tpu.pipeline_mode<synchronous>, transform_indices = @transform_2, window_bounds = array<i64: 72, 3>}, {pipeline_mode = #tpu.pipeline_mode<synchronous>, transform_indices = @transform_3, window_bounds = array<i64: 8, 1>}, {pipeline_mode = #tpu.pipeline_mode<synchronous>, transform_indices = @transform_4, window_bounds = array<i64: 72, 8>}, {pipeline_mode = #tpu.pipeline_mode<synchronous>, transform_indices = @transform_5, window_bounds = array<i64: 72, 8>}, {pipeline_mode = #tpu.pipeline_mode<synchronous>, transform_indices = @transform_6, window_bounds = array<i64: 8, 1>}, {pipeline_mode = #tpu.pipeline_mode<synchronous>, transform_indices = @transform_7, window_bounds = array<i64: 8, 8>}, {pipeline_mode = #tpu.pipeline_mode<synchronous>, transform_indices = @transform_8, window_bounds = array<i64: 8, 1>}, {transform_indices = @transform_9, window_bounds = array<i64: 1, 8, 256>}]} {
    %0 = tpu.iota {dimensions = array<i32: 1>} : vector<1x256xi32>
    %c16_i32 = arith.constant 16 : i32
    %c0_i32 = arith.constant 0 : i32
    %1 = arith.cmpi eq, %c16_i32, %c0_i32 : i32
    %c1_i32 = arith.constant 1 : i32
    %2 = arith.select %1, %c1_i32, %c16_i32 : i32
    %3 = vector.broadcast %2 : i32 to vector<1x256xi32>
    %4 = arith.remsi %0, %3 : vector<1x256xi32>
    %c0_i32_0 = arith.constant 0 : i32
    %5 = vector.broadcast %c0_i32_0 : i32 to vector<1x256xi32>
    %6 = arith.cmpi ne, %4, %5 : vector<1x256xi32>
    %c0_i32_1 = arith.constant 0 : i32
    %7 = vector.broadcast %c0_i32_1 : i32 to vector<1x256xi32>
    %8 = arith.cmpi slt, %4, %7 : vector<1x256xi32>
    %c0_i32_2 = arith.constant 0 : i32
    %9 = arith.cmpi slt, %2, %c0_i32_2 : i32
    %10 = vector.broadcast %9 : i1 to vector<1x256xi1>
    %11 = vector.broadcast %10 : vector<1x256xi1> to vector<1x256xi1>
    %12 = arith.xori %8, %11 : vector<1x256xi1>
    %13 = arith.andi %12, %6 : vector<1x256xi1>
    %14 = vector.broadcast %2 : i32 to vector<1x256xi32>
    %15 = arith.addi %4, %14 : vector<1x256xi32>
    %16 = arith.select %13, %15, %4 : vector<1x256xi1>, vector<1x256xi32>
    %c1_i32_3 = arith.constant 1 : i32
    %17 = vector.broadcast %c1_i32_3 : i32 to vector<1x256xi32>
    %18 = arith.cmpi sge, %16, %17 : vector<1x256xi32>
    %c14_i32 = arith.constant 14 : i32
    %19 = vector.broadcast %c14_i32 : i32 to vector<1x256xi32>
    %20 = arith.cmpi sle, %16, %19 : vector<1x256xi32>
    %c0 = arith.constant 0 : index
    %c0_4 = arith.constant 0 : index
    %21 = vector.load %arg3[%c0, %c0_4] : memref<72x3xbf16, #tpu.memory_space<vmem>>, vector<72x3xbf16>
    %c0_5 = arith.constant 0 : index
    %c0_6 = arith.constant 0 : index
    %22 = vector.load %arg4[%c0_5, %c0_6] : memref<8x1xf32, #tpu.memory_space<vmem>>, vector<8x1xf32>
    %c0_7 = arith.constant 0 : index
    %c0_8 = arith.constant 0 : index
    %23 = vector.load %arg5[%c0_7, %c0_8] : memref<72x8xbf16, #tpu.memory_space<vmem>>, vector<72x8xbf16>
    %c0_9 = arith.constant 0 : index
    %c0_10 = arith.constant 0 : index
    %24 = vector.load %arg6[%c0_9, %c0_10] : memref<72x8xbf16, #tpu.memory_space<vmem>>, vector<72x8xbf16>
    %c0_11 = arith.constant 0 : index
    %c0_12 = arith.constant 0 : index
    %c0_13 = arith.constant 0 : index
    %25 = vector.load %arg1[%c0_11, %c0_12, %c0_13] : memref<1x3x256xbf16, #tpu.memory_space<vmem>>, vector<1x3x256xbf16>
    %26 = vector.shape_cast %25 : vector<1x3x256xbf16> to vector<3x256xbf16>
    %cst = arith.constant 0.000000e+00 : bf16
    %27 = vector.broadcast %cst : bf16 to vector<3x17xbf16>
    %28 = tpu.concatenate %27, %26, %27 in 1 : vector<3x17xbf16>, vector<3x256xbf16>, vector<3x17xbf16> -> vector<3x290xbf16>
    %cst_14 = arith.constant 0.000000e+00 : f32
    %29 = vector.broadcast %cst_14 : f32 to vector<8x256xf32>
    %30 = vector.extract_strided_slice %28 {offsets = [0, 0], sizes = [3, 256], strides = [1, 1]} : vector<3x290xbf16> to vector<3x256xbf16>
    %cst_15 = arith.constant 0.000000e+00 : bf16
    %31 = vector.broadcast %cst_15 : bf16 to vector<3x256xbf16>
    %32 = vector.shape_cast %18 : vector<1x256xi1> to vector<1x256xi1>
    %33 = vector.broadcast %32 : vector<1x256xi1> to vector<3x256xi1>
    %34 = arith.select %33, %30, %31 : vector<3x256xi1>, vector<3x256xbf16>
    %35 = vector.extract_strided_slice %21 {offsets = [0, 0], sizes = [8, 3], strides = [1, 1]} : vector<72x3xbf16> to vector<8x3xbf16>
    %cst_16 = arith.constant dense<0.000000e+00> : vector<8x256xf32>
    %36 = tpu.matmul %35, %34, %cst_16 {dimension_numbers = #tpu.dot_dimension_numbers<[1], [0], [0], [1], [0, 0, 1, 1], [], []>} : vector<8x3xbf16>, vector<3x256xbf16>, vector<8x256xf32> -> vector<8x256xf32>
    %37 = arith.addf %29, %36 : vector<8x256xf32>
    %38 = vector.extract_strided_slice %28 {offsets = [0, 1], sizes = [3, 256], strides = [1, 1]} : vector<3x290xbf16> to vector<3x256xbf16>
    %39 = vector.extract_strided_slice %21 {offsets = [8, 0], sizes = [8, 3], strides = [1, 1]} : vector<72x3xbf16> to vector<8x3xbf16>
    %cst_17 = arith.constant dense<0.000000e+00> : vector<8x256xf32>
    %40 = tpu.matmul %39, %38, %cst_17 {dimension_numbers = #tpu.dot_dimension_numbers<[1], [0], [0], [1], [0, 0, 1, 1], [], []>} : vector<8x3xbf16>, vector<3x256xbf16>, vector<8x256xf32> -> vector<8x256xf32>
    %41 = arith.addf %37, %40 : vector<8x256xf32>
    %42 = vector.extract_strided_slice %28 {offsets = [0, 2], sizes = [3, 256], strides = [1, 1]} : vector<3x290xbf16> to vector<3x256xbf16>
    %cst_18 = arith.constant 0.000000e+00 : bf16
    %43 = vector.broadcast %cst_18 : bf16 to vector<3x256xbf16>
    %44 = vector.shape_cast %20 : vector<1x256xi1> to vector<1x256xi1>
    %45 = vector.broadcast %44 : vector<1x256xi1> to vector<3x256xi1>
    %46 = arith.select %45, %42, %43 : vector<3x256xi1>, vector<3x256xbf16>
    %47 = vector.extract_strided_slice %21 {offsets = [16, 0], sizes = [8, 3], strides = [1, 1]} : vector<72x3xbf16> to vector<8x3xbf16>
    %cst_19 = arith.constant dense<0.000000e+00> : vector<8x256xf32>
    %48 = tpu.matmul %47, %46, %cst_19 {dimension_numbers = #tpu.dot_dimension_numbers<[1], [0], [0], [1], [0, 0, 1, 1], [], []>} : vector<8x3xbf16>, vector<3x256xbf16>, vector<8x256xf32> -> vector<8x256xf32>
    %49 = arith.addf %41, %48 : vector<8x256xf32>
    %50 = vector.extract_strided_slice %28 {offsets = [0, 16], sizes = [3, 256], strides = [1, 1]} : vector<3x290xbf16> to vector<3x256xbf16>
    %cst_20 = arith.constant 0.000000e+00 : bf16
    %51 = vector.broadcast %cst_20 : bf16 to vector<3x256xbf16>
    %52 = vector.shape_cast %18 : vector<1x256xi1> to vector<1x256xi1>
    %53 = vector.broadcast %52 : vector<1x256xi1> to vector<3x256xi1>
    %54 = arith.select %53, %50, %51 : vector<3x256xi1>, vector<3x256xbf16>
    %55 = vector.extract_strided_slice %21 {offsets = [24, 0], sizes = [8, 3], strides = [1, 1]} : vector<72x3xbf16> to vector<8x3xbf16>
    %cst_21 = arith.constant dense<0.000000e+00> : vector<8x256xf32>
    %56 = tpu.matmul %55, %54, %cst_21 {dimension_numbers = #tpu.dot_dimension_numbers<[1], [0], [0], [1], [0, 0, 1, 1], [], []>} : vector<8x3xbf16>, vector<3x256xbf16>, vector<8x256xf32> -> vector<8x256xf32>
    %57 = arith.addf %49, %56 : vector<8x256xf32>
    %58 = vector.extract_strided_slice %28 {offsets = [0, 17], sizes = [3, 256], strides = [1, 1]} : vector<3x290xbf16> to vector<3x256xbf16>
    %59 = vector.extract_strided_slice %21 {offsets = [32, 0], sizes = [8, 3], strides = [1, 1]} : vector<72x3xbf16> to vector<8x3xbf16>
    %cst_22 = arith.constant dense<0.000000e+00> : vector<8x256xf32>
    %60 = tpu.matmul %59, %58, %cst_22 {dimension_numbers = #tpu.dot_dimension_numbers<[1], [0], [0], [1], [0, 0, 1, 1], [], []>} : vector<8x3xbf16>, vector<3x256xbf16>, vector<8x256xf32> -> vector<8x256xf32>
    %61 = arith.addf %57, %60 : vector<8x256xf32>
    %62 = vector.extract_strided_slice %28 {offsets = [0, 18], sizes = [3, 256], strides = [1, 1]} : vector<3x290xbf16> to vector<3x256xbf16>
    %cst_23 = arith.constant 0.000000e+00 : bf16
    %63 = vector.broadcast %cst_23 : bf16 to vector<3x256xbf16>
    %64 = vector.shape_cast %20 : vector<1x256xi1> to vector<1x256xi1>
    %65 = vector.broadcast %64 : vector<1x256xi1> to vector<3x256xi1>
    %66 = arith.select %65, %62, %63 : vector<3x256xi1>, vector<3x256xbf16>
    %67 = vector.extract_strided_slice %21 {offsets = [40, 0], sizes = [8, 3], strides = [1, 1]} : vector<72x3xbf16> to vector<8x3xbf16>
    %cst_24 = arith.constant dense<0.000000e+00> : vector<8x256xf32>
    %68 = tpu.matmul %67, %66, %cst_24 {dimension_numbers = #tpu.dot_dimension_numbers<[1], [0], [0], [1], [0, 0, 1, 1], [], []>} : vector<8x3xbf16>, vector<3x256xbf16>, vector<8x256xf32> -> vector<8x256xf32>
    %69 = arith.addf %61, %68 : vector<8x256xf32>
    %70 = vector.extract_strided_slice %28 {offsets = [0, 32], sizes = [3, 256], strides = [1, 1]} : vector<3x290xbf16> to vector<3x256xbf16>
    %cst_25 = arith.constant 0.000000e+00 : bf16
    %71 = vector.broadcast %cst_25 : bf16 to vector<3x256xbf16>
    %72 = vector.shape_cast %18 : vector<1x256xi1> to vector<1x256xi1>
    %73 = vector.broadcast %72 : vector<1x256xi1> to vector<3x256xi1>
    %74 = arith.select %73, %70, %71 : vector<3x256xi1>, vector<3x256xbf16>
    %75 = vector.extract_strided_slice %21 {offsets = [48, 0], sizes = [8, 3], strides = [1, 1]} : vector<72x3xbf16> to vector<8x3xbf16>
    %cst_26 = arith.constant dense<0.000000e+00> : vector<8x256xf32>
    %76 = tpu.matmul %75, %74, %cst_26 {dimension_numbers = #tpu.dot_dimension_numbers<[1], [0], [0], [1], [0, 0, 1, 1], [], []>} : vector<8x3xbf16>, vector<3x256xbf16>, vector<8x256xf32> -> vector<8x256xf32>
    %77 = arith.addf %69, %76 : vector<8x256xf32>
    %78 = vector.extract_strided_slice %28 {offsets = [0, 33], sizes = [3, 256], strides = [1, 1]} : vector<3x290xbf16> to vector<3x256xbf16>
    %79 = vector.extract_strided_slice %21 {offsets = [56, 0], sizes = [8, 3], strides = [1, 1]} : vector<72x3xbf16> to vector<8x3xbf16>
    %cst_27 = arith.constant dense<0.000000e+00> : vector<8x256xf32>
    %80 = tpu.matmul %79, %78, %cst_27 {dimension_numbers = #tpu.dot_dimension_numbers<[1], [0], [0], [1], [0, 0, 1, 1], [], []>} : vector<8x3xbf16>, vector<3x256xbf16>, vector<8x256xf32> -> vector<8x256xf32>
    %81 = arith.addf %77, %80 : vector<8x256xf32>
    %82 = vector.extract_strided_slice %28 {offsets = [0, 34], sizes = [3, 256], strides = [1, 1]} : vector<3x290xbf16> to vector<3x256xbf16>
    %cst_28 = arith.constant 0.000000e+00 : bf16
    %83 = vector.broadcast %cst_28 : bf16 to vector<3x256xbf16>
    %84 = vector.shape_cast %20 : vector<1x256xi1> to vector<1x256xi1>
    %85 = vector.broadcast %84 : vector<1x256xi1> to vector<3x256xi1>
    %86 = arith.select %85, %82, %83 : vector<3x256xi1>, vector<3x256xbf16>
    %87 = vector.extract_strided_slice %21 {offsets = [64, 0], sizes = [8, 3], strides = [1, 1]} : vector<72x3xbf16> to vector<8x3xbf16>
    %cst_29 = arith.constant dense<0.000000e+00> : vector<8x256xf32>
    %88 = tpu.matmul %87, %86, %cst_29 {dimension_numbers = #tpu.dot_dimension_numbers<[1], [0], [0], [1], [0, 0, 1, 1], [], []>} : vector<8x3xbf16>, vector<3x256xbf16>, vector<8x256xf32> -> vector<8x256xf32>
    %89 = arith.addf %81, %88 : vector<8x256xf32>
    %90 = vector.broadcast %22 : vector<8x1xf32> to vector<8x256xf32>
    %91 = arith.addf %89, %90 : vector<8x256xf32>
    %cst_30 = arith.constant 0.000000e+00 : f32
    %92 = vector.broadcast %cst_30 : f32 to vector<8x256xf32>
    %93 = arith.maximumf %91, %92 : vector<8x256xf32>
    %94 = arith.truncf %93 : vector<8x256xf32> to vector<8x256xbf16>
    %c0_31 = arith.constant 0 : index
    %c0_32 = arith.constant 0 : index
    %c0_33 = arith.constant 0 : index
    %95 = vector.load %arg2[%c0_31, %c0_32, %c0_33] : memref<1x3x256xbf16, #tpu.memory_space<vmem>>, vector<1x3x256xbf16>
    %96 = vector.shape_cast %95 : vector<1x3x256xbf16> to vector<3x256xbf16>
    %cst_34 = arith.constant 0.000000e+00 : bf16
    %97 = vector.broadcast %cst_34 : bf16 to vector<3x17xbf16>
    %98 = tpu.concatenate %97, %96, %97 in 1 : vector<3x17xbf16>, vector<3x256xbf16>, vector<3x17xbf16> -> vector<3x290xbf16>
    %cst_35 = arith.constant 0.000000e+00 : f32
    %99 = vector.broadcast %cst_35 : f32 to vector<8x256xf32>
    %100 = vector.extract_strided_slice %98 {offsets = [0, 0], sizes = [3, 256], strides = [1, 1]} : vector<3x290xbf16> to vector<3x256xbf16>
    %cst_36 = arith.constant 0.000000e+00 : bf16
    %101 = vector.broadcast %cst_36 : bf16 to vector<3x256xbf16>
    %102 = vector.shape_cast %18 : vector<1x256xi1> to vector<1x256xi1>
    %103 = vector.broadcast %102 : vector<1x256xi1> to vector<3x256xi1>
    %104 = arith.select %103, %100, %101 : vector<3x256xi1>, vector<3x256xbf16>
    %105 = vector.extract_strided_slice %21 {offsets = [0, 0], sizes = [8, 3], strides = [1, 1]} : vector<72x3xbf16> to vector<8x3xbf16>
    %cst_37 = arith.constant dense<0.000000e+00> : vector<8x256xf32>
    %106 = tpu.matmul %105, %104, %cst_37 {dimension_numbers = #tpu.dot_dimension_numbers<[1], [0], [0], [1], [0, 0, 1, 1], [], []>} : vector<8x3xbf16>, vector<3x256xbf16>, vector<8x256xf32> -> vector<8x256xf32>
    %107 = arith.addf %99, %106 : vector<8x256xf32>
    %108 = vector.extract_strided_slice %98 {offsets = [0, 1], sizes = [3, 256], strides = [1, 1]} : vector<3x290xbf16> to vector<3x256xbf16>
    %109 = vector.extract_strided_slice %21 {offsets = [8, 0], sizes = [8, 3], strides = [1, 1]} : vector<72x3xbf16> to vector<8x3xbf16>
    %cst_38 = arith.constant dense<0.000000e+00> : vector<8x256xf32>
    %110 = tpu.matmul %109, %108, %cst_38 {dimension_numbers = #tpu.dot_dimension_numbers<[1], [0], [0], [1], [0, 0, 1, 1], [], []>} : vector<8x3xbf16>, vector<3x256xbf16>, vector<8x256xf32> -> vector<8x256xf32>
    %111 = arith.addf %107, %110 : vector<8x256xf32>
    %112 = vector.extract_strided_slice %98 {offsets = [0, 2], sizes = [3, 256], strides = [1, 1]} : vector<3x290xbf16> to vector<3x256xbf16>
    %cst_39 = arith.constant 0.000000e+00 : bf16
    %113 = vector.broadcast %cst_39 : bf16 to vector<3x256xbf16>
    %114 = vector.shape_cast %20 : vector<1x256xi1> to vector<1x256xi1>
    %115 = vector.broadcast %114 : vector<1x256xi1> to vector<3x256xi1>
    %116 = arith.select %115, %112, %113 : vector<3x256xi1>, vector<3x256xbf16>
    %117 = vector.extract_strided_slice %21 {offsets = [16, 0], sizes = [8, 3], strides = [1, 1]} : vector<72x3xbf16> to vector<8x3xbf16>
    %cst_40 = arith.constant dense<0.000000e+00> : vector<8x256xf32>
    %118 = tpu.matmul %117, %116, %cst_40 {dimension_numbers = #tpu.dot_dimension_numbers<[1], [0], [0], [1], [0, 0, 1, 1], [], []>} : vector<8x3xbf16>, vector<3x256xbf16>, vector<8x256xf32> -> vector<8x256xf32>
    %119 = arith.addf %111, %118 : vector<8x256xf32>
    %120 = vector.extract_strided_slice %98 {offsets = [0, 16], sizes = [3, 256], strides = [1, 1]} : vector<3x290xbf16> to vector<3x256xbf16>
    %cst_41 = arith.constant 0.000000e+00 : bf16
    %121 = vector.broadcast %cst_41 : bf16 to vector<3x256xbf16>
    %122 = vector.shape_cast %18 : vector<1x256xi1> to vector<1x256xi1>
    %123 = vector.broadcast %122 : vector<1x256xi1> to vector<3x256xi1>
    %124 = arith.select %123, %120, %121 : vector<3x256xi1>, vector<3x256xbf16>
    %125 = vector.extract_strided_slice %21 {offsets = [24, 0], sizes = [8, 3], strides = [1, 1]} : vector<72x3xbf16> to vector<8x3xbf16>
    %cst_42 = arith.constant dense<0.000000e+00> : vector<8x256xf32>
    %126 = tpu.matmul %125, %124, %cst_42 {dimension_numbers = #tpu.dot_dimension_numbers<[1], [0], [0], [1], [0, 0, 1, 1], [], []>} : vector<8x3xbf16>, vector<3x256xbf16>, vector<8x256xf32> -> vector<8x256xf32>
    %127 = arith.addf %119, %126 : vector<8x256xf32>
    %128 = vector.extract_strided_slice %98 {offsets = [0, 17], sizes = [3, 256], strides = [1, 1]} : vector<3x290xbf16> to vector<3x256xbf16>
    %129 = vector.extract_strided_slice %21 {offsets = [32, 0], sizes = [8, 3], strides = [1, 1]} : vector<72x3xbf16> to vector<8x3xbf16>
    %cst_43 = arith.constant dense<0.000000e+00> : vector<8x256xf32>
    %130 = tpu.matmul %129, %128, %cst_43 {dimension_numbers = #tpu.dot_dimension_numbers<[1], [0], [0], [1], [0, 0, 1, 1], [], []>} : vector<8x3xbf16>, vector<3x256xbf16>, vector<8x256xf32> -> vector<8x256xf32>
    %131 = arith.addf %127, %130 : vector<8x256xf32>
    %132 = vector.extract_strided_slice %98 {offsets = [0, 18], sizes = [3, 256], strides = [1, 1]} : vector<3x290xbf16> to vector<3x256xbf16>
    %cst_44 = arith.constant 0.000000e+00 : bf16
    %133 = vector.broadcast %cst_44 : bf16 to vector<3x256xbf16>
    %134 = vector.shape_cast %20 : vector<1x256xi1> to vector<1x256xi1>
    %135 = vector.broadcast %134 : vector<1x256xi1> to vector<3x256xi1>
    %136 = arith.select %135, %132, %133 : vector<3x256xi1>, vector<3x256xbf16>
    %137 = vector.extract_strided_slice %21 {offsets = [40, 0], sizes = [8, 3], strides = [1, 1]} : vector<72x3xbf16> to vector<8x3xbf16>
    %cst_45 = arith.constant dense<0.000000e+00> : vector<8x256xf32>
    %138 = tpu.matmul %137, %136, %cst_45 {dimension_numbers = #tpu.dot_dimension_numbers<[1], [0], [0], [1], [0, 0, 1, 1], [], []>} : vector<8x3xbf16>, vector<3x256xbf16>, vector<8x256xf32> -> vector<8x256xf32>
    %139 = arith.addf %131, %138 : vector<8x256xf32>
    %140 = vector.extract_strided_slice %98 {offsets = [0, 32], sizes = [3, 256], strides = [1, 1]} : vector<3x290xbf16> to vector<3x256xbf16>
    %cst_46 = arith.constant 0.000000e+00 : bf16
    %141 = vector.broadcast %cst_46 : bf16 to vector<3x256xbf16>
    %142 = vector.shape_cast %18 : vector<1x256xi1> to vector<1x256xi1>
    %143 = vector.broadcast %142 : vector<1x256xi1> to vector<3x256xi1>
    %144 = arith.select %143, %140, %141 : vector<3x256xi1>, vector<3x256xbf16>
    %145 = vector.extract_strided_slice %21 {offsets = [48, 0], sizes = [8, 3], strides = [1, 1]} : vector<72x3xbf16> to vector<8x3xbf16>
    %cst_47 = arith.constant dense<0.000000e+00> : vector<8x256xf32>
    %146 = tpu.matmul %145, %144, %cst_47 {dimension_numbers = #tpu.dot_dimension_numbers<[1], [0], [0], [1], [0, 0, 1, 1], [], []>} : vector<8x3xbf16>, vector<3x256xbf16>, vector<8x256xf32> -> vector<8x256xf32>
    %147 = arith.addf %139, %146 : vector<8x256xf32>
    %148 = vector.extract_strided_slice %98 {offsets = [0, 33], sizes = [3, 256], strides = [1, 1]} : vector<3x290xbf16> to vector<3x256xbf16>
    %149 = vector.extract_strided_slice %21 {offsets = [56, 0], sizes = [8, 3], strides = [1, 1]} : vector<72x3xbf16> to vector<8x3xbf16>
    %cst_48 = arith.constant dense<0.000000e+00> : vector<8x256xf32>
    %150 = tpu.matmul %149, %148, %cst_48 {dimension_numbers = #tpu.dot_dimension_numbers<[1], [0], [0], [1], [0, 0, 1, 1], [], []>} : vector<8x3xbf16>, vector<3x256xbf16>, vector<8x256xf32> -> vector<8x256xf32>
    %151 = arith.addf %147, %150 : vector<8x256xf32>
    %152 = vector.extract_strided_slice %98 {offsets = [0, 34], sizes = [3, 256], strides = [1, 1]} : vector<3x290xbf16> to vector<3x256xbf16>
    %cst_49 = arith.constant 0.000000e+00 : bf16
    %153 = vector.broadcast %cst_49 : bf16 to vector<3x256xbf16>
    %154 = vector.shape_cast %20 : vector<1x256xi1> to vector<1x256xi1>
    %155 = vector.broadcast %154 : vector<1x256xi1> to vector<3x256xi1>
    %156 = arith.select %155, %152, %153 : vector<3x256xi1>, vector<3x256xbf16>
    %157 = vector.extract_strided_slice %21 {offsets = [64, 0], sizes = [8, 3], strides = [1, 1]} : vector<72x3xbf16> to vector<8x3xbf16>
    %cst_50 = arith.constant dense<0.000000e+00> : vector<8x256xf32>
    %158 = tpu.matmul %157, %156, %cst_50 {dimension_numbers = #tpu.dot_dimension_numbers<[1], [0], [0], [1], [0, 0, 1, 1], [], []>} : vector<8x3xbf16>, vector<3x256xbf16>, vector<8x256xf32> -> vector<8x256xf32>
    %159 = arith.addf %151, %158 : vector<8x256xf32>
    %160 = vector.broadcast %22 : vector<8x1xf32> to vector<8x256xf32>
    %161 = arith.addf %159, %160 : vector<8x256xf32>
    %cst_51 = arith.constant 0.000000e+00 : f32
    %162 = vector.broadcast %cst_51 : f32 to vector<8x256xf32>
    %163 = arith.maximumf %161, %162 : vector<8x256xf32>
    %164 = arith.truncf %163 : vector<8x256xf32> to vector<8x256xbf16>
    %cst_52 = arith.constant 0.000000e+00 : f32
    %165 = vector.broadcast %cst_52 : f32 to vector<8x256xf32>
    %cst_53 = arith.constant 0.000000e+00 : bf16
    %166 = vector.broadcast %cst_53 : bf16 to vector<8x17xbf16>
    %167 = tpu.concatenate %166, %94, %166 in 1 : vector<8x17xbf16>, vector<8x256xbf16>, vector<8x17xbf16> -> vector<8x290xbf16>
    %168 = vector.extract_strided_slice %167 {offsets = [0, 0], sizes = [8, 256], strides = [1, 1]} : vector<8x290xbf16> to vector<8x256xbf16>
    %cst_54 = arith.constant 0.000000e+00 : bf16
    %169 = vector.broadcast %cst_54 : bf16 to vector<8x256xbf16>
    %170 = vector.shape_cast %18 : vector<1x256xi1> to vector<1x256xi1>
    %171 = vector.broadcast %170 : vector<1x256xi1> to vector<8x256xi1>
    %172 = arith.select %171, %168, %169 : vector<8x256xi1>, vector<8x256xbf16>
    %173 = vector.extract_strided_slice %23 {offsets = [0, 0], sizes = [8, 8], strides = [1, 1]} : vector<72x8xbf16> to vector<8x8xbf16>
    %cst_55 = arith.constant dense<0.000000e+00> : vector<8x256xf32>
    %174 = tpu.matmul %173, %172, %cst_55 {dimension_numbers = #tpu.dot_dimension_numbers<[1], [0], [0], [1], [0, 0, 1, 1], [], []>} : vector<8x8xbf16>, vector<8x256xbf16>, vector<8x256xf32> -> vector<8x256xf32>
    %175 = arith.addf %165, %174 : vector<8x256xf32>
    %176 = vector.extract_strided_slice %167 {offsets = [0, 1], sizes = [8, 256], strides = [1, 1]} : vector<8x290xbf16> to vector<8x256xbf16>
    %177 = vector.extract_strided_slice %23 {offsets = [8, 0], sizes = [8, 8], strides = [1, 1]} : vector<72x8xbf16> to vector<8x8xbf16>
    %cst_56 = arith.constant dense<0.000000e+00> : vector<8x256xf32>
    %178 = tpu.matmul %177, %176, %cst_56 {dimension_numbers = #tpu.dot_dimension_numbers<[1], [0], [0], [1], [0, 0, 1, 1], [], []>} : vector<8x8xbf16>, vector<8x256xbf16>, vector<8x256xf32> -> vector<8x256xf32>
    %179 = arith.addf %175, %178 : vector<8x256xf32>
    %180 = vector.extract_strided_slice %167 {offsets = [0, 2], sizes = [8, 256], strides = [1, 1]} : vector<8x290xbf16> to vector<8x256xbf16>
    %cst_57 = arith.constant 0.000000e+00 : bf16
    %181 = vector.broadcast %cst_57 : bf16 to vector<8x256xbf16>
    %182 = vector.shape_cast %20 : vector<1x256xi1> to vector<1x256xi1>
    %183 = vector.broadcast %182 : vector<1x256xi1> to vector<8x256xi1>
    %184 = arith.select %183, %180, %181 : vector<8x256xi1>, vector<8x256xbf16>
    %185 = vector.extract_strided_slice %23 {offsets = [16, 0], sizes = [8, 8], strides = [1, 1]} : vector<72x8xbf16> to vector<8x8xbf16>
    %cst_58 = arith.constant dense<0.000000e+00> : vector<8x256xf32>
    %186 = tpu.matmul %185, %184, %cst_58 {dimension_numbers = #tpu.dot_dimension_numbers<[1], [0], [0], [1], [0, 0, 1, 1], [], []>} : vector<8x8xbf16>, vector<8x256xbf16>, vector<8x256xf32> -> vector<8x256xf32>
    %187 = arith.addf %179, %186 : vector<8x256xf32>
    %188 = vector.extract_strided_slice %167 {offsets = [0, 16], sizes = [8, 256], strides = [1, 1]} : vector<8x290xbf16> to vector<8x256xbf16>
    %cst_59 = arith.constant 0.000000e+00 : bf16
    %189 = vector.broadcast %cst_59 : bf16 to vector<8x256xbf16>
    %190 = vector.shape_cast %18 : vector<1x256xi1> to vector<1x256xi1>
    %191 = vector.broadcast %190 : vector<1x256xi1> to vector<8x256xi1>
    %192 = arith.select %191, %188, %189 : vector<8x256xi1>, vector<8x256xbf16>
    %193 = vector.extract_strided_slice %23 {offsets = [24, 0], sizes = [8, 8], strides = [1, 1]} : vector<72x8xbf16> to vector<8x8xbf16>
    %cst_60 = arith.constant dense<0.000000e+00> : vector<8x256xf32>
    %194 = tpu.matmul %193, %192, %cst_60 {dimension_numbers = #tpu.dot_dimension_numbers<[1], [0], [0], [1], [0, 0, 1, 1], [], []>} : vector<8x8xbf16>, vector<8x256xbf16>, vector<8x256xf32> -> vector<8x256xf32>
    %195 = arith.addf %187, %194 : vector<8x256xf32>
    %196 = vector.extract_strided_slice %167 {offsets = [0, 17], sizes = [8, 256], strides = [1, 1]} : vector<8x290xbf16> to vector<8x256xbf16>
    %197 = vector.extract_strided_slice %23 {offsets = [32, 0], sizes = [8, 8], strides = [1, 1]} : vector<72x8xbf16> to vector<8x8xbf16>
    %cst_61 = arith.constant dense<0.000000e+00> : vector<8x256xf32>
    %198 = tpu.matmul %197, %196, %cst_61 {dimension_numbers = #tpu.dot_dimension_numbers<[1], [0], [0], [1], [0, 0, 1, 1], [], []>} : vector<8x8xbf16>, vector<8x256xbf16>, vector<8x256xf32> -> vector<8x256xf32>
    %199 = arith.addf %195, %198 : vector<8x256xf32>
    %200 = vector.extract_strided_slice %167 {offsets = [0, 18], sizes = [8, 256], strides = [1, 1]} : vector<8x290xbf16> to vector<8x256xbf16>
    %cst_62 = arith.constant 0.000000e+00 : bf16
    %201 = vector.broadcast %cst_62 : bf16 to vector<8x256xbf16>
    %202 = vector.shape_cast %20 : vector<1x256xi1> to vector<1x256xi1>
    %203 = vector.broadcast %202 : vector<1x256xi1> to vector<8x256xi1>
    %204 = arith.select %203, %200, %201 : vector<8x256xi1>, vector<8x256xbf16>
    %205 = vector.extract_strided_slice %23 {offsets = [40, 0], sizes = [8, 8], strides = [1, 1]} : vector<72x8xbf16> to vector<8x8xbf16>
    %cst_63 = arith.constant dense<0.000000e+00> : vector<8x256xf32>
    %206 = tpu.matmul %205, %204, %cst_63 {dimension_numbers = #tpu.dot_dimension_numbers<[1], [0], [0], [1], [0, 0, 1, 1], [], []>} : vector<8x8xbf16>, vector<8x256xbf16>, vector<8x256xf32> -> vector<8x256xf32>
    %207 = arith.addf %199, %206 : vector<8x256xf32>
    %208 = vector.extract_strided_slice %167 {offsets = [0, 32], sizes = [8, 256], strides = [1, 1]} : vector<8x290xbf16> to vector<8x256xbf16>
    %cst_64 = arith.constant 0.000000e+00 : bf16
    %209 = vector.broadcast %cst_64 : bf16 to vector<8x256xbf16>
    %210 = vector.shape_cast %18 : vector<1x256xi1> to vector<1x256xi1>
    %211 = vector.broadcast %210 : vector<1x256xi1> to vector<8x256xi1>
    %212 = arith.select %211, %208, %209 : vector<8x256xi1>, vector<8x256xbf16>
    %213 = vector.extract_strided_slice %23 {offsets = [48, 0], sizes = [8, 8], strides = [1, 1]} : vector<72x8xbf16> to vector<8x8xbf16>
    %cst_65 = arith.constant dense<0.000000e+00> : vector<8x256xf32>
    %214 = tpu.matmul %213, %212, %cst_65 {dimension_numbers = #tpu.dot_dimension_numbers<[1], [0], [0], [1], [0, 0, 1, 1], [], []>} : vector<8x8xbf16>, vector<8x256xbf16>, vector<8x256xf32> -> vector<8x256xf32>
    %215 = arith.addf %207, %214 : vector<8x256xf32>
    %216 = vector.extract_strided_slice %167 {offsets = [0, 33], sizes = [8, 256], strides = [1, 1]} : vector<8x290xbf16> to vector<8x256xbf16>
    %217 = vector.extract_strided_slice %23 {offsets = [56, 0], sizes = [8, 8], strides = [1, 1]} : vector<72x8xbf16> to vector<8x8xbf16>
    %cst_66 = arith.constant dense<0.000000e+00> : vector<8x256xf32>
    %218 = tpu.matmul %217, %216, %cst_66 {dimension_numbers = #tpu.dot_dimension_numbers<[1], [0], [0], [1], [0, 0, 1, 1], [], []>} : vector<8x8xbf16>, vector<8x256xbf16>, vector<8x256xf32> -> vector<8x256xf32>
    %219 = arith.addf %215, %218 : vector<8x256xf32>
    %220 = vector.extract_strided_slice %167 {offsets = [0, 34], sizes = [8, 256], strides = [1, 1]} : vector<8x290xbf16> to vector<8x256xbf16>
    %cst_67 = arith.constant 0.000000e+00 : bf16
    %221 = vector.broadcast %cst_67 : bf16 to vector<8x256xbf16>
    %222 = vector.shape_cast %20 : vector<1x256xi1> to vector<1x256xi1>
    %223 = vector.broadcast %222 : vector<1x256xi1> to vector<8x256xi1>
    %224 = arith.select %223, %220, %221 : vector<8x256xi1>, vector<8x256xbf16>
    %225 = vector.extract_strided_slice %23 {offsets = [64, 0], sizes = [8, 8], strides = [1, 1]} : vector<72x8xbf16> to vector<8x8xbf16>
    %cst_68 = arith.constant dense<0.000000e+00> : vector<8x256xf32>
    %226 = tpu.matmul %225, %224, %cst_68 {dimension_numbers = #tpu.dot_dimension_numbers<[1], [0], [0], [1], [0, 0, 1, 1], [], []>} : vector<8x8xbf16>, vector<8x256xbf16>, vector<8x256xf32> -> vector<8x256xf32>
    %227 = arith.addf %219, %226 : vector<8x256xf32>
    %cst_69 = arith.constant 0.000000e+00 : bf16
    %228 = vector.broadcast %cst_69 : bf16 to vector<8x17xbf16>
    %229 = tpu.concatenate %228, %164, %228 in 1 : vector<8x17xbf16>, vector<8x256xbf16>, vector<8x17xbf16> -> vector<8x290xbf16>
    %230 = vector.extract_strided_slice %229 {offsets = [0, 0], sizes = [8, 256], strides = [1, 1]} : vector<8x290xbf16> to vector<8x256xbf16>
    %cst_70 = arith.constant 0.000000e+00 : bf16
    %231 = vector.broadcast %cst_70 : bf16 to vector<8x256xbf16>
    %232 = vector.shape_cast %18 : vector<1x256xi1> to vector<1x256xi1>
    %233 = vector.broadcast %232 : vector<1x256xi1> to vector<8x256xi1>
    %234 = arith.select %233, %230, %231 : vector<8x256xi1>, vector<8x256xbf16>
    %235 = vector.extract_strided_slice %24 {offsets = [0, 0], sizes = [8, 8], strides = [1, 1]} : vector<72x8xbf16> to vector<8x8xbf16>
    %cst_71 = arith.constant dense<0.000000e+00> : vector<8x256xf32>
    %236 = tpu.matmul %235, %234, %cst_71 {dimension_numbers = #tpu.dot_dimension_numbers<[1], [0], [0], [1], [0, 0, 1, 1], [], []>} : vector<8x8xbf16>, vector<8x256xbf16>, vector<8x256xf32> -> vector<8x256xf32>
    %237 = arith.addf %227, %236 : vector<8x256xf32>
    %238 = vector.extract_strided_slice %229 {offsets = [0, 1], sizes = [8, 256], strides = [1, 1]} : vector<8x290xbf16> to vector<8x256xbf16>
    %239 = vector.extract_strided_slice %24 {offsets = [8, 0], sizes = [8, 8], strides = [1, 1]} : vector<72x8xbf16> to vector<8x8xbf16>
    %cst_72 = arith.constant dense<0.000000e+00> : vector<8x256xf32>
    %240 = tpu.matmul %239, %238, %cst_72 {dimension_numbers = #tpu.dot_dimension_numbers<[1], [0], [0], [1], [0, 0, 1, 1], [], []>} : vector<8x8xbf16>, vector<8x256xbf16>, vector<8x256xf32> -> vector<8x256xf32>
    %241 = arith.addf %237, %240 : vector<8x256xf32>
    %242 = vector.extract_strided_slice %229 {offsets = [0, 2], sizes = [8, 256], strides = [1, 1]} : vector<8x290xbf16> to vector<8x256xbf16>
    %cst_73 = arith.constant 0.000000e+00 : bf16
    %243 = vector.broadcast %cst_73 : bf16 to vector<8x256xbf16>
    %244 = vector.shape_cast %20 : vector<1x256xi1> to vector<1x256xi1>
    %245 = vector.broadcast %244 : vector<1x256xi1> to vector<8x256xi1>
    %246 = arith.select %245, %242, %243 : vector<8x256xi1>, vector<8x256xbf16>
    %247 = vector.extract_strided_slice %24 {offsets = [16, 0], sizes = [8, 8], strides = [1, 1]} : vector<72x8xbf16> to vector<8x8xbf16>
    %cst_74 = arith.constant dense<0.000000e+00> : vector<8x256xf32>
    %248 = tpu.matmul %247, %246, %cst_74 {dimension_numbers = #tpu.dot_dimension_numbers<[1], [0], [0], [1], [0, 0, 1, 1], [], []>} : vector<8x8xbf16>, vector<8x256xbf16>, vector<8x256xf32> -> vector<8x256xf32>
    %249 = arith.addf %241, %248 : vector<8x256xf32>
    %250 = vector.extract_strided_slice %229 {offsets = [0, 16], sizes = [8, 256], strides = [1, 1]} : vector<8x290xbf16> to vector<8x256xbf16>
    %cst_75 = arith.constant 0.000000e+00 : bf16
    %251 = vector.broadcast %cst_75 : bf16 to vector<8x256xbf16>
    %252 = vector.shape_cast %18 : vector<1x256xi1> to vector<1x256xi1>
    %253 = vector.broadcast %252 : vector<1x256xi1> to vector<8x256xi1>
    %254 = arith.select %253, %250, %251 : vector<8x256xi1>, vector<8x256xbf16>
    %255 = vector.extract_strided_slice %24 {offsets = [24, 0], sizes = [8, 8], strides = [1, 1]} : vector<72x8xbf16> to vector<8x8xbf16>
    %cst_76 = arith.constant dense<0.000000e+00> : vector<8x256xf32>
    %256 = tpu.matmul %255, %254, %cst_76 {dimension_numbers = #tpu.dot_dimension_numbers<[1], [0], [0], [1], [0, 0, 1, 1], [], []>} : vector<8x8xbf16>, vector<8x256xbf16>, vector<8x256xf32> -> vector<8x256xf32>
    %257 = arith.addf %249, %256 : vector<8x256xf32>
    %258 = vector.extract_strided_slice %229 {offsets = [0, 17], sizes = [8, 256], strides = [1, 1]} : vector<8x290xbf16> to vector<8x256xbf16>
    %259 = vector.extract_strided_slice %24 {offsets = [32, 0], sizes = [8, 8], strides = [1, 1]} : vector<72x8xbf16> to vector<8x8xbf16>
    %cst_77 = arith.constant dense<0.000000e+00> : vector<8x256xf32>
    %260 = tpu.matmul %259, %258, %cst_77 {dimension_numbers = #tpu.dot_dimension_numbers<[1], [0], [0], [1], [0, 0, 1, 1], [], []>} : vector<8x8xbf16>, vector<8x256xbf16>, vector<8x256xf32> -> vector<8x256xf32>
    %261 = arith.addf %257, %260 : vector<8x256xf32>
    %262 = vector.extract_strided_slice %229 {offsets = [0, 18], sizes = [8, 256], strides = [1, 1]} : vector<8x290xbf16> to vector<8x256xbf16>
    %cst_78 = arith.constant 0.000000e+00 : bf16
    %263 = vector.broadcast %cst_78 : bf16 to vector<8x256xbf16>
    %264 = vector.shape_cast %20 : vector<1x256xi1> to vector<1x256xi1>
    %265 = vector.broadcast %264 : vector<1x256xi1> to vector<8x256xi1>
    %266 = arith.select %265, %262, %263 : vector<8x256xi1>, vector<8x256xbf16>
    %267 = vector.extract_strided_slice %24 {offsets = [40, 0], sizes = [8, 8], strides = [1, 1]} : vector<72x8xbf16> to vector<8x8xbf16>
    %cst_79 = arith.constant dense<0.000000e+00> : vector<8x256xf32>
    %268 = tpu.matmul %267, %266, %cst_79 {dimension_numbers = #tpu.dot_dimension_numbers<[1], [0], [0], [1], [0, 0, 1, 1], [], []>} : vector<8x8xbf16>, vector<8x256xbf16>, vector<8x256xf32> -> vector<8x256xf32>
    %269 = arith.addf %261, %268 : vector<8x256xf32>
    %270 = vector.extract_strided_slice %229 {offsets = [0, 32], sizes = [8, 256], strides = [1, 1]} : vector<8x290xbf16> to vector<8x256xbf16>
    %cst_80 = arith.constant 0.000000e+00 : bf16
    %271 = vector.broadcast %cst_80 : bf16 to vector<8x256xbf16>
    %272 = vector.shape_cast %18 : vector<1x256xi1> to vector<1x256xi1>
    %273 = vector.broadcast %272 : vector<1x256xi1> to vector<8x256xi1>
    %274 = arith.select %273, %270, %271 : vector<8x256xi1>, vector<8x256xbf16>
    %275 = vector.extract_strided_slice %24 {offsets = [48, 0], sizes = [8, 8], strides = [1, 1]} : vector<72x8xbf16> to vector<8x8xbf16>
    %cst_81 = arith.constant dense<0.000000e+00> : vector<8x256xf32>
    %276 = tpu.matmul %275, %274, %cst_81 {dimension_numbers = #tpu.dot_dimension_numbers<[1], [0], [0], [1], [0, 0, 1, 1], [], []>} : vector<8x8xbf16>, vector<8x256xbf16>, vector<8x256xf32> -> vector<8x256xf32>
    %277 = arith.addf %269, %276 : vector<8x256xf32>
    %278 = vector.extract_strided_slice %229 {offsets = [0, 33], sizes = [8, 256], strides = [1, 1]} : vector<8x290xbf16> to vector<8x256xbf16>
    %279 = vector.extract_strided_slice %24 {offsets = [56, 0], sizes = [8, 8], strides = [1, 1]} : vector<72x8xbf16> to vector<8x8xbf16>
    %cst_82 = arith.constant dense<0.000000e+00> : vector<8x256xf32>
    %280 = tpu.matmul %279, %278, %cst_82 {dimension_numbers = #tpu.dot_dimension_numbers<[1], [0], [0], [1], [0, 0, 1, 1], [], []>} : vector<8x8xbf16>, vector<8x256xbf16>, vector<8x256xf32> -> vector<8x256xf32>
    %281 = arith.addf %277, %280 : vector<8x256xf32>
    %282 = vector.extract_strided_slice %229 {offsets = [0, 34], sizes = [8, 256], strides = [1, 1]} : vector<8x290xbf16> to vector<8x256xbf16>
    %cst_83 = arith.constant 0.000000e+00 : bf16
    %283 = vector.broadcast %cst_83 : bf16 to vector<8x256xbf16>
    %284 = vector.shape_cast %20 : vector<1x256xi1> to vector<1x256xi1>
    %285 = vector.broadcast %284 : vector<1x256xi1> to vector<8x256xi1>
    %286 = arith.select %285, %282, %283 : vector<8x256xi1>, vector<8x256xbf16>
    %287 = vector.extract_strided_slice %24 {offsets = [64, 0], sizes = [8, 8], strides = [1, 1]} : vector<72x8xbf16> to vector<8x8xbf16>
    %cst_84 = arith.constant dense<0.000000e+00> : vector<8x256xf32>
    %288 = tpu.matmul %287, %286, %cst_84 {dimension_numbers = #tpu.dot_dimension_numbers<[1], [0], [0], [1], [0, 0, 1, 1], [], []>} : vector<8x8xbf16>, vector<8x256xbf16>, vector<8x256xf32> -> vector<8x256xf32>
    %289 = arith.addf %281, %288 : vector<8x256xf32>
    %c0_85 = arith.constant 0 : index
    %c0_86 = arith.constant 0 : index
    %290 = vector.load %arg7[%c0_85, %c0_86] : memref<8x1xf32, #tpu.memory_space<vmem>>, vector<8x1xf32>
    %291 = vector.broadcast %290 : vector<8x1xf32> to vector<8x256xf32>
    %292 = arith.addf %289, %291 : vector<8x256xf32>
    %cst_87 = arith.constant 0.000000e+00 : f32
    %293 = vector.broadcast %cst_87 : f32 to vector<8x256xf32>
    %294 = arith.maximumf %292, %293 : vector<8x256xf32>
    %295 = arith.truncf %294 : vector<8x256xf32> to vector<8x256xbf16>
    %c0_88 = arith.constant 0 : index
    %c0_89 = arith.constant 0 : index
    %296 = vector.load %arg8[%c0_88, %c0_89] : memref<8x8xbf16, #tpu.memory_space<vmem>>, vector<8x8xbf16>
    %cst_90 = arith.constant dense<0.000000e+00> : vector<8x256xf32>
    %297 = tpu.matmul %296, %295, %cst_90 {dimension_numbers = #tpu.dot_dimension_numbers<[1], [0], [0], [1], [0, 0, 1, 1], [], []>} : vector<8x8xbf16>, vector<8x256xbf16>, vector<8x256xf32> -> vector<8x256xf32>
    %c0_91 = arith.constant 0 : index
    %c0_92 = arith.constant 0 : index
    %298 = vector.load %arg9[%c0_91, %c0_92] : memref<8x1xf32, #tpu.memory_space<vmem>>, vector<8x1xf32>
    %299 = vector.broadcast %298 : vector<8x1xf32> to vector<8x256xf32>
    %300 = arith.addf %297, %299 : vector<8x256xf32>
    %c0_93 = arith.constant 0 : index
    %c0_94 = arith.constant 0 : index
    %c0_95 = arith.constant 0 : index
    %301 = vector.load %arg10[%c0_93, %c0_94, %c0_95] : memref<1x8x256xf32, #tpu.memory_space<vmem>>, vector<1x8x256xf32>
    %302 = vector.shape_cast %301 : vector<1x8x256xf32> to vector<8x256xf32>
    %303 = vector.shape_cast %300 : vector<8x256xf32> to vector<1x8x256xf32>
    tpu.vector_store %arg10[%c0_93, %c0_94, %c0_95], %303 {strides = array<i32>} : memref<1x8x256xf32, #tpu.memory_space<vmem>>, vector<1x8x256xf32>,
    return
  }
  func.func @transform_0(%arg0: i32) -> (i32, i32, i32) {
    %c0_i32 = arith.constant 0 : i32
    %c0_i32_0 = arith.constant 0 : i32
    %c0_i32_1 = arith.constant 0 : i32
    return %arg0, %c0_i32, %c0_i32_0 : i32, i32, i32
  }
  func.func @transform_1(%arg0: i32) -> (i32, i32, i32) {
    %c0_i32 = arith.constant 0 : i32
    %c0_i32_0 = arith.constant 0 : i32
    %c0_i32_1 = arith.constant 0 : i32
    return %arg0, %c0_i32, %c0_i32_0 : i32, i32, i32
  }
  func.func @transform_2(%arg0: i32) -> (i32, i32) {
    %c0_i32 = arith.constant 0 : i32
    %c0_i32_0 = arith.constant 0 : i32
    %c0_i32_1 = arith.constant 0 : i32
    return %c0_i32, %c0_i32_0 : i32, i32
  }
  func.func @transform_3(%arg0: i32) -> (i32, i32) {
    %c0_i32 = arith.constant 0 : i32
    %c0_i32_0 = arith.constant 0 : i32
    %c0_i32_1 = arith.constant 0 : i32
    return %c0_i32, %c0_i32_0 : i32, i32
  }
  func.func @transform_4(%arg0: i32) -> (i32, i32) {
    %c0_i32 = arith.constant 0 : i32
    %c0_i32_0 = arith.constant 0 : i32
    %c0_i32_1 = arith.constant 0 : i32
    return %c0_i32, %c0_i32_0 : i32, i32
  }
  func.func @transform_5(%arg0: i32) -> (i32, i32) {
    %c0_i32 = arith.constant 0 : i32
    %c0_i32_0 = arith.constant 0 : i32
    %c0_i32_1 = arith.constant 0 : i32
    return %c0_i32, %c0_i32_0 : i32, i32
  }
  func.func @transform_6(%arg0: i32) -> (i32, i32) {
    %c0_i32 = arith.constant 0 : i32
    %c0_i32_0 = arith.constant 0 : i32
    %c0_i32_1 = arith.constant 0 : i32
    return %c0_i32, %c0_i32_0 : i32, i32
  }
  func.func @transform_7(%arg0: i32) -> (i32, i32) {
    %c0_i32 = arith.constant 0 : i32
    %c0_i32_0 = arith.constant 0 : i32
    %c0_i32_1 = arith.constant 0 : i32
    return %c0_i32, %c0_i32_0 : i32, i32
  }
  func.func @transform_8(%arg0: i32) -> (i32, i32) {
    %c0_i32 = arith.constant 0 : i32
    %c0_i32_0 = arith.constant 0 : i32
    %c0_i32_1 = arith.constant 0 : i32
    return %c0_i32, %c0_i32_0 : i32, i32
  }
  func.func @transform_9(%arg0: i32) -> (i32, i32, i32) {
    %c0_i32 = arith.constant 0 : i32
    %c0_i32_0 = arith.constant 0 : i32
    %c0_i32_1 = arith.constant 0 : i32
    return %arg0, %c0_i32, %c0_i32_0 : i32, i32, i32
  }
}

</mosaic_0001>

<bundles_post_ra>
// kernel: disaster_sam_v1.1
= control target key start
LH: loop header
LB: loop body
LE: loop exit
PB: predicated region body
PF: predicated region fallthrough
CT: control target
= control target key end

     0   :  { %s3134_s30 = smov 0   ;;  %s3911_s0 = inlined_call_operand.vmem [shape: bf16[2,3,256], index: 0, kind: input, shape index: {}]   ;;  %s3912_s1 = inlined_call_operand.vmem [shape: bf16[2,3,256], index: 1, kind: input, shape index: {}]   ;;  %s3913_s2 = inlined_call_operand.vmem [shape: bf16[72,3], index: 2, kind: input, shape index: {}]   ;;  %s3914_s3 = inlined_call_operand.vmem [shape: f32[8,1], index: 3, kind: input, shape index: {}]   ;;  %s3915_s4 = inlined_call_operand.vmem [shape: bf16[72,8], index: 4, kind: input, shape index: {}]   ;;  %s3916_s5 = inlined_call_operand.vmem [shape: bf16[72,8], index: 5, kind: input, shape index: {}]   ;;  %s3917_s6 = inlined_call_operand.vmem [shape: f32[8,1], index: 6, kind: input, shape index: {}]   ;;  %s3918_s7 = inlined_call_operand.vmem [shape: bf16[8,8], index: 7, kind: input, shape index: {}]   ;;  %s3919_s8 = inlined_call_operand.vmem [shape: f32[8,1], index: 8, kind: input, shape index: {}]   ;;  %s3920_s9 = inlined_call_operand.vmem [shape: f32[2,8,256], index: 9, kind: output, shape index: {}]  }
   0x1 LB: > { %s2960_s10 = sadd.s32 4294967295, %s3066_s30   ;;  %p2964_p0 = scmp.ge.s32.totalorder %s3066_s30, 1  ;;  %s3066_s30 = sphi %s3134_s30, %s19_s30  }
   0x2   : > { %p297_p1 = scmp.lt.s32.totalorder %s3066_s30, 3 }
   0x4   : > { %p298_p2 = pnand %p2964_p0, %p297_p1 }
   0x5   : > { %p338_p3 = scmp.lt.s32.totalorder (!%p298_p2), %s2960_s10, 1  ;;  %s3069_s15 = smov (!%p298_p2), 17  }
   0x6   : > { %301 = sbr.rel (%p298_p2) target bundleno = 1240 (0x4d8), region = 56  ;;  %s3070_s16 = smov (!%p298_p2), 2  }
   0x7   : > { %s3071_s17 = smov (!%p298_p2), 16   ;;  %s3072_s18 = smov (!%p298_p2), 18  }
   0x8   : > { %s3073_s19 = smov (!%p298_p2), 32   ;;  %s3074_s23 = smov (!%p298_p2), 34  }
   0x9   : > { %s3075_s24 = smov (!%p298_p2), 111   ;;  %s3076_s25 = smov (!%p298_p2), 127  }
   0xa   : > { %s3078_s28 = smov (!%p298_p2), 126   ;;  %s3079_s29 = smov (!%p298_p2), 112  }
   0xb   : > { %v356_v0 = vlaneseq  ;;  %v3068_v1 = vmov 0   ;;  %s3995_s10 = smov (!%p338_p3, %s2960_s10), 1  ;;  %vm429_vm6 = vcmask 138240   ;;  %vm473_vm7 = vcmask 1040384   ;;  %v3220_v35 = vld [vmem:[%s3913_s2] sm:$0xf] }
   0xc   : > { %515 = vmatprep.mubr.bf16.mxu0 %v3068_v1  ;;  %565 = vmatprep.mubr.bf16.mxu1 %v3068_v1  ;;  %s3031_s11 = sshll.u32 %s3995_s10, 2  ;;  %vm474_vm9 = vcmask 1041408   ;;  %v3077_v21 = vmov 65535   ;;  %vm3923_vm14 = vcmask 23552   ;;  %s3081_s12 = smov 96  }
   0xd   : > { %v357_v2 = vand.u32 127, %v356_v0  ;;  %3058 = vset.pattern.permute.xlu0 %v3068_v1  ;;  %3059 = vset.pattern.permute.xlu1 %v3068_v1  ;;  %v447_v3 = vshrl.u32 %v356_v0, 7  ;;  %s342_s14 = scalar_lea.vmem %s3911_s0, %s3031_s11  ;;  %s347_s22 = scalar_lea.vmem %s3912_s1, %s3031_s11  ;;  %v475_v22 = vsel %vm473_vm7, 4294967295, %v3077_v21  ;;  %v396_v21 = vld [vmem:[%s3914_s3] sm:$0xff] }
   0xe   : > { %v2971_v6 = vld.sshfl [vmem:[%s342_s14] sm:$0x33 pattern:$0x76325410]  ;;  %v3197_v28 = vsel %vm474_vm9, %v475_v22, 0  ;;  %s3080_s11 = smov 110  }
   0xf   : > { %v358_v4 = vadd.s32 128, %v357_v2  ;;  %v363_v5 = vand.u32 15, %v357_v2  ;;  %425 = vrot.lane.b32.xlu0 %v2971_v6, %s3069_s15  ;;  %v424_v8 = vcombine.high %v2971_v6, %v2971_v6  ;;  %v448_v9 = vsub.s32 0, %v447_v3  ;;  %s3082_s13 = smov 95   ;;  %s3083_s14 = smov 94  }
  0x10   : > { %v452_v10 = vsub.s32 4, %v447_v3  ;;  %v2981_v17 = vld.sshfl [vmem:[%s347_s22] sm:$0x33 pattern:$0x76325410] }
  0x11   : > { %v370_v7 = vand.u32 15, %v358_v4  ;;  %vm385_vm0 = vcmp.le.s32.totalorder %v363_v5, 14  ;;  %vm383_vm1 = vcmp.ge.s32.totalorder %v363_v5, 1  ;;  %v1110_v18 = vcombine.high %v2981_v17, %v2981_v17 }
  0x13   : > { %vm386_vm2 = vcmp.le.s32.totalorder %v370_v7, 14  ;;  %vm384_vm3 = vcmp.ge.s32.totalorder %v370_v7, 1  ;;  %427 = vrot.lane.b32.xlu0 %v424_v8, %s3069_s15 }
  0x14   : > { %vm578_vm4 = vmpackc.low %vm386_vm2, %vm385_vm0  ;;  %vm592_vm0 = vcmask 15360  }
  0x15   : > { %v579_v11 = vsel %vm578_vm4, 65537, %v3068_v1  ;;  %vm444_vm5 = vmpackc.low %vm384_vm3, %vm383_vm1 }
  0x16   : > { %v583_v12 = vrot.slane %v579_v11, %v448_v9  ;;  %v445_v13 = vsel %vm444_vm5, 65537, %v3068_v1  ;;  %v587_v15 = vrot.slane %v579_v11, %v452_v10  ;;  %vm668_vm5 = vcmask 130048  }
  0x17   : > { %v3158_v14 = vrot.slane %v445_v13, %v448_v9  ;;  %v3161_v16 = vrot.slane %v445_v13, %v452_v10 }
  0x18   : > { %588 = vrot.lane.b32.xlu1 %v583_v12, %s3070_s16 }
  0x19   : > { %664 = vrot.lane.b32.xlu0 %v3158_v14, %s3071_s17  ;;  %vm3922_vm8 = vcmp.ne.s16.totalorder %v3161_v16, 0  ;;  %vm3921_vm10 = vcmp.ne.s16.totalorder %v3158_v14, 0 }
  0x1c   : > { %590 = vrot.lane.b32.xlu1 %v587_v15, %s3070_s16 }
  0x1d   : > { %801 = vrot.lane.b32.xlu0 %v583_v12, %s3072_s18 }
  0x20   : > { %666 = vrot.lane.b32.xlu1 %v3161_v16, %s3071_s17 }
  0x21   : > { %877 = vrot.lane.b32.xlu0 %v3158_v14, %s3073_s19 }
  0x24   : > { %803 = vrot.lane.b32.xlu1 %v587_v15, %s3072_s18 }
  0x25   : > { %1014 = vrot.lane.b32.xlu0 %v583_v12, %s3074_s23 }
  0x28   : > { %879 = vrot.lane.b32.xlu1 %v3161_v16, %s3073_s19 }
  0x29   : > { %1111 = vrot.lane.b32.xlu0 %v2981_v17, %s3069_s15 }
  0x2c   : > { %1016 = vrot.lane.b32.xlu1 %v587_v15, %s3074_s23 }
  0x30   : > { %1113 = vrot.lane.b32.xlu1 %v1110_v18, %s3069_s15 }
  0x81   : > { %v426_v19 = vpop.permute.xlu0 %425 }
  0x82   : > { %v3174_v20 = vsel %vm429_vm6, 0, %v426_v19 }
  0x83   : > { %740 = vrot.lane.b32.xlu1 %v3174_v20, %s3075_s24  ;;  %460 = vrot.lane.b32.xlu0 %v3174_v20, %s3076_s25  ;;  %v456_v29 = vsel %vm3921_vm10, %v3174_v20, 0  ;;  %vm881_vm10 = vcmask 261120  }
  0x84   : > { %v528_v32 = vand.u32 %v3197_v28, %v456_v29 }
  0x85   : > { %v428_v23 = vpop.permute.xlu0 %427 }
  0x86   : > { %v3183_v24 = vsel %vm429_vm6, %v426_v19, %v428_v23  ;;  %v3186_v25 = vsel %vm429_vm6, %v428_v23, 0 }
  0x87   : > { %464 = vrot.lane.b32.xlu1 %v3186_v25, %s3076_s25  ;;  %462 = vrot.lane.b32.xlu0 %v3183_v24, %s3076_s25  ;;  %v457_v27 = vsel %vm3922_vm8, %v3183_v24, 0 }
  0x88   : > { %v531_v30 = vand.u32 %v3197_v28, %v457_v27 }
  0x8a   : > { %v3188_v26 = vpop.permute.xlu1 %588  ;;  %547 = vmatprep.subr.bf16.mxu1 %v531_v30 }
  0x8b   : > { %v3203_v31 = vpop.permute.xlu0 %664  ;;  %vm594_vm11 = vcmp.ne.s16.totalorder %v3188_v26, 0  ;;  %742 = vrot.lane.b32.xlu1 %v3183_v24, %s3075_s24  ;;  %744 = vrot.lane.b32.xlu0 %v3186_v25, %s3075_s24 }
  0x8c   : > { %548 = vmatpush1.bf16.msra.mxu1 %v528_v32  ;;  %v597_v36 = vsel %vm594_vm11, %v3174_v20, 0  ;;  %vm670_vm13 = vcmp.ne.s16.totalorder %v3203_v31, 0 }
  0x8d   : > { %v673_v40 = vsel %vm670_vm13, %v3174_v20, 0 }
  0x8e   : > { %v3207_v33 = vpop.permute.xlu1 %590 }
  0x8f   : > { %vm3934_vm12 = vcmp.ne.s16.totalorder %v3207_v33, 0  ;;  %603 = vrot.lane.b32.xlu1 %v597_v36, %s3078_s28  ;;  %v3230_v38 = vpop.permute.xlu0 %801  ;;  %2973 = vmatmul.mubr.msk.bf16.vlgmr.msra.gmra.mxu1 %vm3923_vm14, %v3220_v35  ;;  %v3249_v42 = vsel %vm592_vm0, %v3188_v26, %v3207_v33  ;;  %vm805_vm0 = vcmask 146432  }
  0x90   : > { %v599_v34 = vsel %vm3934_vm12, %v3186_v25, 0  ;;  %729 = vmatprep.mubr.bf16.mxu1 %v3068_v1  ;;  %vm807_vm1 = vcmp.ne.s16.totalorder %v3230_v38, 0  ;;  %vm3933_vm3 = vcmp.ne.s16.totalorder %v3249_v42, 0 }
  0x91   : > { %607 = vrot.lane.b32.xlu0 %v599_v34, %s3078_s28  ;;  %v810_v44 = vsel %vm807_vm1, %v3174_v20, 0  ;;  %v598_v48 = vsel %vm3933_vm3, %v3183_v24, 0 }
  0x92   : > { %v3226_v37 = vpop.permute.xlu1 %666 }
  0x93   : > { %vm3931_vm15 = vcmp.ne.s16.totalorder %v3226_v37, 0  ;;  %v3263_v46 = vpop.permute.xlu0 %877  ;;  %v3277_v49 = vsel %vm668_vm5, %v3203_v31, %v3226_v37 }
  0x94   : > { %v675_v39 = vsel %vm3931_vm15, %v3186_v25, 0  ;;  %vm883_vm7 = vcmp.ne.s16.totalorder %v3263_v46, 0  ;;  %vm3932_vm9 = vcmp.ne.s16.totalorder %v3277_v49, 0 }
  0x95   : > { %683 = vrot.lane.b32.xlu1 %v675_v39, %s3079_s29  ;;  %679 = vrot.lane.b32.xlu0 %v673_v40, %s3079_s29  ;;  %v886_v50 = vsel %vm883_vm7, %v3174_v20, 0  ;;  %v674_v52 = vsel %vm3932_vm9, %v3183_v24, 0  ;;  %v3422_v39 = vld [vmem:[%s3913_s2 + $0x4] sm:$0xf] }
  0x96   : > { %v3243_v41 = vpop.permute.xlu1 %803 }
  0x97   : > { %vm3929_vm2 = vcmp.ne.s16.totalorder %v3243_v41, 0  ;;  %v3286_v51 = vpop.permute.xlu0 %1014  ;;  %v3297_v53 = vsel %vm805_vm0, %v3230_v38, %v3243_v41  ;;  %vm1018_vm0 = vcmask 277504  }
  0x98   : > { %v812_v43 = vsel %vm3929_vm2, %v3186_v25, 0  ;;  %vm3924_vm5 = vcmp.ne.s16.totalorder %v3286_v51, 0  ;;  %vm3930_vm8 = vcmp.ne.s16.totalorder %v3297_v53, 0 }
  0x99   : > { %820 = vrot.lane.b32.xlu1 %v812_v43, %s3080_s11  ;;  %816 = vrot.lane.b32.xlu0 %v810_v44, %s3080_s11  ;;  %v1023_v56 = vsel %vm3924_vm5, %v3174_v20, 0  ;;  %v811_v57 = vsel %vm3930_vm8, %v3183_v24, 0 }
  0x9a   : > { %v3259_v45 = vpop.permute.xlu1 %879 }
  0x9b   : > { %vm3928_vm4 = vcmp.ne.s16.totalorder %v3259_v45, 0  ;;  %v3301_v54 = vsel %vm881_vm10, %v3263_v46, %v3259_v45  ;;  %v1112_v63 = vpop.permute.xlu0 %1111 }
  0x9c   : > { %v888_v47 = vsel %vm3928_vm4, %v3186_v25, 0  ;;  %vm3927_vm14 = vcmp.ne.s16.totalorder %v3301_v54, 0  ;;  %v3340_v3 = vsel %vm429_vm6, 0, %v1112_v63 }
  0x9d   : > { %605 = vrot.lane.b32.xlu1 %v598_v48, %s3078_s28  ;;  %896 = vrot.lane.b32.xlu0 %v888_v47, %s3081_s12  ;;  %v887_v58 = vsel %vm3927_vm14, %v3183_v24, 0  ;;  %v1229_v4 = vsel %vm594_vm11, %v3340_v3, 0  ;;  %v1292_v7 = vsel %vm670_vm13, %v3340_v3, 0  ;;  %v1412_v9 = vsel %vm807_vm1, %v3340_v3, 0 }
  0x9e   : > { %v3303_v55 = vpop.permute.xlu1 %1016  ;;  %v1475_v13 = vsel %vm883_vm7, %v3340_v3, 0 }
  0x9f   : > { %vm3926_vm10 = vcmp.ne.s16.totalorder %v3303_v55, 0  ;;  %v3324_v60 = vsel %vm1018_vm0, %v3286_v51, %v3303_v55  ;;  %vm3939_vm0 = vcmp.ne.s16.totalorder %v3286_v51, 0 }
  0xa0   : > { %v1025_v62 = vsel %vm3926_vm10, %v3186_v25, 0  ;;  %vm3925_vm5 = vcmp.ne.s16.totalorder %v3324_v60, 0 }
  0xa1   : > { %955 = vrot.lane.b32.xlu0 %v3183_v24, %s3082_s13  ;;  %892 = vrot.lane.b32.xlu1 %v886_v50, %s3081_s12  ;;  %v1024_v2 = vsel %vm3925_vm5, %v3183_v24, 0 }
  0xa2   : > { %v1114_v59 = vpop.permute.xlu1 %1113 }
  0xa3   : > { %v1121_v61 = vsel %vm429_vm6, %v1114_v59, 0  ;;  %v3334_v0 = vsel %vm429_vm6, %v1112_v63, %v1114_v59 }
  0xa4   : > { %v1294_v5 = vsel %vm3931_vm15, %v1121_v61, 0  ;;  %v1231_v6 = vsel %vm3934_vm12, %v1121_v61, 0  ;;  %v1230_v8 = vsel %vm3933_vm3, %v3334_v0, 0  ;;  %v1293_v10 = vsel %vm3932_vm9, %v3334_v0, 0 }
  0xa5   : > { %681 = vrot.lane.b32.xlu0 %v674_v52, %s3079_s29  ;;  %957 = vrot.lane.b32.xlu1 %v3186_v25, %s3082_s13  ;;  %v1414_v11 = vsel %vm3929_vm2, %v1121_v61, 0  ;;  %v1477_v12 = vsel %vm3928_vm4, %v1121_v61, 0  ;;  %v1413_v15 = vsel %vm3930_vm8, %v3334_v0, 0  ;;  %v1476_v17 = vsel %vm3927_vm14, %v3334_v0, 0 }
  0xa6   : > { %v1596_v18 = vsel %vm3925_vm5, %v3334_v0, 0  ;;  %v1597_v19 = vsel %vm3926_vm10, %v1121_v61, 0  ;;  %vm3935_vm5 = vcmask 1039360   ;;  %vm746_vm10 = vcmask 908288  }
  0xa7   : > { %vm609_vm14 = vcmask 1031168   ;;  %vm3941_vm4 = vcmask 23552   ;;  %vm3938_vm2 = vcmask 777216   ;;  %vm822_vm8 = vcmask 900096  }
  0xa8   : > { %vm3942_vm15 = vcmask 23552   ;;  %vm3945_vm12 = vcmp.ne.s16.totalorder %v3161_v16, 0 }
  0xa9   : > { %953 = vrot.lane.b32.xlu0 %v3174_v20, %s3082_s13  ;;  %1029 = vrot.lane.b32.xlu1 %v1023_v56, %s3083_s14  ;;  %v1595_v20 = vsel %vm3939_vm0, %v3340_v3, 0  ;;  %vm3940_vm0 = vcmask 23552   ;;  %vm3943_vm9 = vmmov %vm3942_vm15 }
  0xaa   : > { %vm3944_vm3 = vmmov %vm3943_vm9 }
  0xad   : > { %818 = vrot.lane.b32.xlu0 %v811_v57, %s3080_s11  ;;  %894 = vrot.lane.b32.xlu1 %v887_v58, %s3081_s12 }
  0xb1   : > { %1033 = vrot.lane.b32.xlu0 %v1025_v62, %s3083_s14  ;;  %1131 = vrot.lane.b32.xlu1 %v1121_v61, %s3076_s25 }
  0xb5   : > { %1031 = vrot.lane.b32.xlu1 %v1024_v2, %s3083_s14  ;;  %1129 = vrot.lane.b32.xlu0 %v3334_v0, %s3076_s25 }
  0xb9   : > { %1235 = vrot.lane.b32.xlu1 %v1229_v4, %s3078_s28  ;;  %1127 = vrot.lane.b32.xlu0 %v3340_v3, %s3076_s25 }
  0xbd   : > { %1302 = vrot.lane.b32.xlu1 %v1294_v5, %s3079_s29  ;;  %1239 = vrot.lane.b32.xlu0 %v1231_v6, %s3078_s28  ;;  %v3437_v6 = vld [vmem:[%s3913_s2 + $0x8] sm:$0xf] }
  0xc1   : > { %1357 = vrot.lane.b32.xlu1 %v3334_v0, %s3075_s24  ;;  %1298 = vrot.lane.b32.xlu0 %v1292_v7, %s3079_s29 }
  0xc5   : > { %1359 = vrot.lane.b32.xlu0 %v1121_v61, %s3075_s24  ;;  %1237 = vrot.lane.b32.xlu1 %v1230_v8, %s3078_s28 }
  0xc9   : > { %1418 = vrot.lane.b32.xlu0 %v1412_v9, %s3080_s11  ;;  %1355 = vrot.lane.b32.xlu1 %v3340_v3, %s3075_s24 }
  0xcd   : > { %1300 = vrot.lane.b32.xlu0 %v1293_v10, %s3079_s29  ;;  %1422 = vrot.lane.b32.xlu1 %v1414_v11, %s3080_s11 }
  0xd1   : > { %1485 = vrot.lane.b32.xlu0 %v1477_v12, %s3081_s12  ;;  %1481 = vrot.lane.b32.xlu1 %v1475_v13, %s3081_s12 }
  0xd5   : > { %1420 = vrot.lane.b32.xlu0 %v1413_v15, %s3080_s11  ;;  %1483 = vrot.lane.b32.xlu1 %v1476_v17, %s3081_s12 }
  0xd9   : > { %1540 = vrot.lane.b32.xlu0 %v3334_v0, %s3082_s13  ;;  %1542 = vrot.lane.b32.xlu1 %v1121_v61, %s3082_s13 }
  0xdd   : > { %1538 = vrot.lane.b32.xlu0 %v3340_v3, %s3082_s13  ;;  %1603 = vrot.lane.b32.xlu1 %v1596_v18, %s3083_s14  ;;  %v3450_v18 = vld [vmem:[%s3913_s2 + $0xc] sm:$0xf] }
  0xe1   : > { %1605 = vrot.lane.b32.xlu0 %v1597_v19, %s3083_s14  ;;  %1601 = vrot.lane.b32.xlu1 %v1595_v20, %s3083_s14  ;;  %v3455_v19 = vld [vmem:[%s3913_s2 + $0x10] sm:$0xf] }
  0xe5   : > { %1092 = vperm.xlu0 %3058, %v396_v21  }
  0xf5   : > { %v741_v22 = vpop.permute.xlu1 %740  ;;  %v461_v23 = vpop.permute.xlu0 %460 }
  0xf9   : > { %v465_v24 = vpop.permute.xlu1 %464  ;;  %v463_v25 = vpop.permute.xlu0 %462 }
  0xfa   : > { %v468_v27 = vsel %vm3935_vm5, %v463_v25, %v465_v24  ;;  %v467_v29 = vsel %vm3935_vm5, %v461_v23, %v463_v25 }
  0xfb   : > { %v481_v30 = vand.u32 %v3197_v28, %v468_v27  ;;  %v478_v32 = vand.u32 %v3197_v28, %v467_v29 }
  0xfd   : > { %v743_v34 = vpop.permute.xlu1 %742  ;;  %497 = vmatprep.subr.bf16.mxu0 %v481_v30  ;;  %v745_v36 = vpop.permute.xlu0 %744 }
  0xfe   : > { %498 = vmatpush1.bf16.msra.mxu0 %v478_v32  ;;  %v748_v57 = vsel %vm746_vm10, %v743_v34, %v745_v36  ;;  %v747_v63 = vsel %vm746_vm10, %v741_v22, %v743_v34 }
  0xff   : > { %v756_v2 = vand.u32 %v748_v57, %v3197_v28  ;;  %v753_v7 = vand.u32 %v747_v63, %v3197_v28 }
 0x101   : > { %v604_v40 = vpop.permute.xlu1 %603  ;;  %2972 = vmatmul.mubr.msk.bf16.vlgmr.msra.gmra.mxu0 %vm3940_vm0, %v3422_v39  ;;  %vm685_vm0 = vcmask 916480  }
 0x102   : > { %653 = vmatprep.mubr.bf16.mxu0 %v3068_v1 }
 0x103   : > { %v608_v43 = vpop.permute.xlu0 %607 }
 0x107   : > { %v684_v44 = vpop.permute.xlu1 %683  ;;  %v680_v47 = vpop.permute.xlu0 %679 }
 0x10b   : > { %v821_v48 = vpop.permute.xlu1 %820  ;;  %v817_v50 = vpop.permute.xlu0 %816 }
 0x10f   : > { %v606_v52 = vpop.permute.xlu1 %605  ;;  %v897_v56 = vpop.permute.xlu0 %896 }
 0x110   : > { %v610_v58 = vsel %vm609_vm14, %v604_v40, %v606_v52  ;;  %v611_v59 = vsel %vm609_vm14, %v606_v52, %v608_v43 }
 0x111   : > { %v616_v61 = vand.u32 %v610_v58, %v3197_v28  ;;  %v619_v62 = vand.u32 %v611_v59, %v3197_v28 }
 0x113   : > { %v893_v4 = vpop.permute.xlu1 %892  ;;  %635 = vmatprep.subr.bf16.mxu0 %v619_v62  ;;  %v956_v5 = vpop.permute.xlu0 %955 }
 0x114   : > { %636 = vmatpush1.bf16.msra.mxu0 %v616_v61  ;;  %v1124_v61 = vsel %vm3945_vm12, %v3334_v0, 0  ;;  %vm3947_vm12 = vmmov %vm3943_vm9 }
 0x115   : > { %772 = vmatprep.subr.bf16.mxu0 %v756_v2 }
 0x117   : > { %v958_v8 = vpop.permute.xlu1 %957  ;;  %2974 = vmatmul.mubr.msk.bf16.vlgmr.msra.gmra.mxu0 %vm3941_vm4, %v3437_v6  ;;  %v682_v9 = vpop.permute.xlu0 %681  ;;  %vm3937_vm4 = vcmask 785408  }
 0x118   : > { %v686_v10 = vsel %vm685_vm0, %v680_v47, %v682_v9  ;;  %v687_v11 = vsel %vm685_vm0, %v682_v9, %v684_v44  ;;  %773 = vmatpush1.bf16.msra.mxu0 %v753_v7  ;;  %790 = vmatprep.mubr.bf16.mxu0 %v3068_v1  ;;  %v961_v20 = vsel %vm3938_vm2, %v956_v5, %v958_v8  ;;  %v3477_v47 = vld [vmem:[%s3913_s2 + $0x14] sm:$0xf]  ;;  %v3508_v9 = vld [vmem:[%s3913_s2 + $0x1c] sm:$0xf] }
 0x119   : > { %v692_v12 = vand.u32 %v686_v10, %v3197_v28  ;;  %v695_v13 = vand.u32 %v687_v11, %v3197_v28  ;;  %v969_v36 = vand.u32 %v961_v20, %v3197_v28  ;;  %v1186_v7 = vand.u32 %v1124_v61, %v3197_v28  ;;  %v3513_v10 = vld [vmem:[%s3913_s2 + $0x20] sm:$0xf] }
 0x11b   : > { %v1030_v15 = vpop.permute.xlu1 %1029  ;;  %711 = vmatprep.subr.bf16.mxu1 %v695_v13  ;;  %v954_v17 = vpop.permute.xlu0 %953 }
 0x11c   : > { %712 = vmatpush1.bf16.msra.mxu1 %v692_v12  ;;  %v960_v40 = vsel %vm3938_vm2, %v954_v17, %v956_v5 }
 0x11f   : > { %v895_v21 = vpop.permute.xlu1 %894  ;;  %2975 = vmatmul.mubr.msk.bf16.vlgmr.msra.gmra.mxu1 %vm3942_vm15, %v3450_v18  ;;  %2976 = vmatmul.mubr.msk.bf16.vlgmr.msra.gmra.mxu0 %vm3943_vm9, %v3455_v19  ;;  %v819_v22 = vpop.permute.xlu0 %818  ;;  %vm3936_vm15 = vcmask 769024  }
 0x120   : > { %v899_v23 = vsel %vm3937_vm4, %v893_v4, %v895_v21  ;;  %v900_v24 = vsel %vm3937_vm4, %v895_v21, %v897_v56  ;;  %v823_v25 = vsel %vm822_vm8, %v817_v50, %v819_v22  ;;  %v824_v27 = vsel %vm822_vm8, %v819_v22, %v821_v48  ;;  %866 = vmatprep.mubr.bf16.mxu1 %v3068_v1  ;;  %v3482_v48 = vld [vmem:[%s3913_s2 + $0x18] sm:$0xf] }
 0x121   : > { %v905_v29 = vand.u32 %v899_v23, %v3197_v28  ;;  %v908_v30 = vand.u32 %v900_v24, %v3197_v28  ;;  %v829_v32 = vand.u32 %v823_v25, %v3197_v28  ;;  %v832_v34 = vand.u32 %v824_v27, %v3197_v28  ;;  %942 = vmatprep.mubr.bf16.mxu0 %v3068_v1 }
 0x122   : > { %v966_v50 = vand.u32 %v960_v40, %v3197_v28 }
 0x123   : > { %v1132_v43 = vpop.permute.xlu1 %1131  ;;  %848 = vmatprep.subr.bf16.mxu1 %v832_v34  ;;  %924 = vmatprep.subr.bf16.mxu0 %v908_v30  ;;  %v1034_v44 = vpop.permute.xlu0 %1033 }
 0x124   : > { %849 = vmatpush1.bf16.msra.mxu1 %v829_v32  ;;  %925 = vmatpush1.bf16.msra.mxu0 %v905_v29 }
 0x125   : > { %985 = vmatprep.subr.bf16.mxu1 %v969_v36 }
 0x127   : > { %v1032_v52 = vpop.permute.xlu1 %1031  ;;  %2977 = vmatmul.mubr.msk.bf16.vlgmr.msra.gmra.mxu1 %vm3943_vm9, %v3477_v47  ;;  %2978 = vmatmul.mubr.msk.bf16.vlgmr.msra.gmra.mxu0 %vm3944_vm3, %v3482_v48  ;;  %v1130_v56 = vpop.permute.xlu0 %1129  ;;  %vm3946_vm3 = vcmp.ne.s16.totalorder %v3158_v14, 0 }
 0x128   : > { %v1036_v57 = vsel %vm3936_vm15, %v1030_v15, %v1032_v52  ;;  %v1037_v58 = vsel %vm3936_vm15, %v1032_v52, %v1034_v44  ;;  %v1134_v59 = vsel %vm3935_vm5, %v1130_v56, %v1132_v43  ;;  %986 = vmatpush1.bf16.msra.mxu1 %v966_v50  ;;  %1003 = vmatprep.mubr.bf16.mxu1 %v3068_v1  ;;  %v1123_v0 = vsel %vm3946_vm3, %v3340_v3, 0  ;;  %vm3948_vm3 = vmmov %vm3943_vm9 }
 0x129   : > { %v1042_v62 = vand.u32 %v1036_v57, %v3197_v28  ;;  %v1045_v63 = vand.u32 %v1037_v58, %v3197_v28  ;;  %v1139_v2 = vand.u32 %v1134_v59, %v3197_v28  ;;  %1079 = vmatprep.mubr.bf16.mxu0 %v3068_v1  ;;  %v1183_v12 = vand.u32 %v1123_v0, %v3197_v28 }
 0x12b   : > { %v1236_v4 = vpop.permute.xlu1 %1235  ;;  %1061 = vmatprep.subr.bf16.mxu0 %v1045_v63  ;;  %1155 = vmatprep.subr.bf16.mxu1 %v1139_v2  ;;  %v1128_v5 = vpop.permute.xlu0 %1127 }
 0x12c   : > { %v1133_v8 = vsel %vm3935_vm5, %v1128_v5, %v1130_v56  ;;  %1062 = vmatpush1.bf16.msra.mxu0 %v1042_v62  ;;  %vm3949_vm5 = vmmov %vm3948_vm3 }
 0x12d   : > { %v1136_v11 = vand.u32 %v1133_v8, %v3197_v28  ;;  %1202 = vmatprep.subr.bf16.mxu0 %v1186_v7 }
 0x12f   : > { %v1303_v13 = vpop.permute.xlu1 %1302  ;;  %2979 = vmatmul.mubr.msk.bf16.vlgmr.msra.gmra.mxu1 %vm3947_vm12, %v3508_v9  ;;  %2980 = vmatmul.mubr.msk.bf16.vlgmr.msra.gmra.mxu0 %vm3943_vm9, %v3513_v10  ;;  %v1240_v3 = vpop.permute.xlu0 %1239  ;;  %vm3951_vm12 = vmmov %vm3948_vm3 }
 0x130   : > { %1156 = vmatpush1.bf16.msra.mxu1 %v1136_v11  ;;  %1203 = vmatpush1.bf16.msra.mxu0 %v1183_v12  ;;  %vm3952_vm9 = vmmov %vm3948_vm3 }
 0x131   : > { %1173 = vmatprep.mubr.bf16.mxu1 %v3068_v1  ;;  %1220 = vmatprep.mubr.bf16.mxu0 %v3068_v1 }
 0x133   : > { %v1358_v15 = vpop.permute.xlu1 %1357  ;;  %v1299_v17 = vpop.permute.xlu0 %1298 }
 0x137   : > { %v1238_v20 = vpop.permute.xlu1 %1237  ;;  %v1360_v21 = vpop.permute.xlu0 %1359  ;;  %2982 = vmatmul.mubr.msk.bf16.vlgmr.msra.gmra.mxu1 %vm3948_vm3, %v3422_v39  ;;  %2983 = vmatmul.mubr.msk.bf16.vlgmr.msra.gmra.mxu0 %vm3949_vm5, %v3220_v35  ;;  %vm3950_vm5 = vmmov %vm3948_vm3 }
 0x138   : > { %v1241_v22 = vsel %vm609_vm14, %v1236_v4, %v1238_v20  ;;  %v1242_v23 = vsel %vm609_vm14, %v1238_v20, %v1240_v3  ;;  %v1362_v24 = vsel %vm746_vm10, %v1358_v15, %v1360_v21  ;;  %1281 = vmatprep.mubr.bf16.mxu1 %v3068_v1  ;;  %1344 = vmatprep.mubr.bf16.mxu0 %v3068_v1 }
 0x139   : > { %v1244_v25 = vand.u32 %v1241_v22, %v3197_v28  ;;  %v1247_v27 = vand.u32 %v1242_v23, %v3197_v28  ;;  %v1367_v29 = vand.u32 %v1362_v24, %v3197_v28 }
 0x13b   : > { %v1356_v39 = vpop.permute.xlu1 %1355  ;;  %1263 = vmatprep.subr.bf16.mxu1 %v1247_v27  ;;  %v1419_v30 = vpop.permute.xlu0 %1418 }
 0x13c   : > { %v1361_v35 = vsel %vm746_vm10, %v1356_v39, %v1358_v15  ;;  %1264 = vmatpush1.bf16.msra.mxu1 %v1244_v25 }
 0x13d   : > { %v1364_v32 = vand.u32 %v1361_v35, %v3197_v28  ;;  %1383 = vmatprep.subr.bf16.mxu1 %v1367_v29 }
 0x13f   : > { %v1423_v34 = vpop.permute.xlu1 %1422  ;;  %v1301_v36 = vpop.permute.xlu0 %1300  ;;  %2984 = vmatmul.mubr.msk.bf16.vlgmr.msra.gmra.mxu1 %vm3950_vm5, %v3437_v6  ;;  %vm3953_vm5 = vmmov %vm3948_vm3 }
 0x140   : > { %v1304_v40 = vsel %vm685_vm0, %v1299_v17, %v1301_v36  ;;  %v1305_v43 = vsel %vm685_vm0, %v1301_v36, %v1303_v13  ;;  %1384 = vmatpush1.bf16.msra.mxu1 %v1364_v32  ;;  %1401 = vmatprep.mubr.bf16.mxu1 %v3068_v1 }
 0x141   : > { %v1307_v44 = vand.u32 %v1304_v40, %v3197_v28  ;;  %v1310_v50 = vand.u32 %v1305_v43, %v3197_v28 }
 0x143   : > { %v1482_v52 = vpop.permute.xlu1 %1481  ;;  %1326 = vmatprep.subr.bf16.mxu0 %v1310_v50  ;;  %v1486_v56 = vpop.permute.xlu0 %1485 }
 0x144   : > { %1327 = vmatpush1.bf16.msra.mxu0 %v1307_v44 }
 0x147   : > { %v1484_v57 = vpop.permute.xlu1 %1483  ;;  %2985 = vmatmul.mubr.msk.bf16.vlgmr.msra.gmra.mxu0 %vm3951_vm12, %v3450_v18  ;;  %v1421_v6 = vpop.permute.xlu0 %1420  ;;  %2986 = vmatmul.mubr.msk.bf16.vlgmr.msra.gmra.mxu1 %vm3952_vm9, %v3455_v19  ;;  %vm3954_vm12 = vmmov %vm3948_vm3 }
 0x148   : > { %v1487_v58 = vsel %vm3937_vm4, %v1482_v52, %v1484_v57  ;;  %v1488_v59 = vsel %vm3937_vm4, %v1484_v57, %v1486_v56  ;;  %v1424_v61 = vsel %vm822_vm8, %v1419_v30, %v1421_v6  ;;  %v1425_v62 = vsel %vm822_vm8, %v1421_v6, %v1423_v34  ;;  %1464 = vmatprep.mubr.bf16.mxu0 %v3068_v1  ;;  %vm3955_vm9 = vmmov %vm3948_vm3 }
 0x149   : > { %v1490_v63 = vand.u32 %v1487_v58, %v3197_v28  ;;  %v1493_v2 = vand.u32 %v1488_v59, %v3197_v28  ;;  %v1427_v18 = vand.u32 %v1424_v61, %v3197_v28  ;;  %v1430_v4 = vand.u32 %v1425_v62, %v3197_v28  ;;  %1527 = vmatprep.mubr.bf16.mxu1 %v3068_v1 }
 0x14a   : > { %vm3962_vm4 = vcmp.ne.s16.totalorder %v3226_v37, 0 }
 0x14b   : > { %v1543_v19 = vpop.permute.xlu1 %1542  ;;  %1446 = vmatprep.subr.bf16.mxu0 %v1430_v4  ;;  %1509 = vmatprep.subr.bf16.mxu1 %v1493_v2  ;;  %v1541_v5 = vpop.permute.xlu0 %1540 }
 0x14c   : > { %v1545_v7 = vsel %vm3938_vm2, %v1541_v5, %v1543_v19  ;;  %1447 = vmatpush1.bf16.msra.mxu0 %v1427_v18  ;;  %1510 = vmatpush1.bf16.msra.mxu1 %v1490_v63 }
 0x14d   : > { %v1550_v0 = vand.u32 %v1545_v7, %v3197_v28 }
 0x14f   : > { %v1604_v8 = vpop.permute.xlu1 %1603  ;;  %2987 = vmatmul.mubr.msk.bf16.vlgmr.msra.gmra.mxu0 %vm3948_vm3, %v3477_v47  ;;  %1566 = vmatprep.subr.bf16.mxu0 %v1550_v0  ;;  %v1539_v11 = vpop.permute.xlu0 %1538  ;;  %vm1694_vm3 = vcmask 1043456  }
 0x150   : > { %v1544_v12 = vsel %vm3938_vm2, %v1539_v11, %v1541_v5  ;;  %2988 = vmatmul.mubr.msk.bf16.vlgmr.msra.gmra.mxu1 %vm3953_vm5, %v3482_v48  ;;  %1584 = vmatprep.mubr.bf16.mxu0 %v3068_v1  ;;  %v567_v3 = vpop.f32.mrf.mxu1  ;;  %vm3956_vm5 = vcmp.ne.s16.totalorder %v3158_v14, 0  ;;  %vm3963_vm2 = vcmp.ne.s16.totalorder %v3297_v53, 0 }
 0x151   : > { %v1547_v13 = vand.u32 %v1544_v12, %v3197_v28  ;;  %1647 = vmatprep.mubr.bf16.mxu1 %v3068_v1 }
 0x152   : > { %v569_v21 = vpop.f32.mrf.mxu1 }
 0x153   : > { %v1602_v15 = vpop.permute.xlu1 %1601  ;;  %1567 = vmatpush1.bf16.msra.mxu0 %v1547_v13  ;;  %v1606_v17 = vpop.permute.xlu0 %1605 }
 0x154   : > { %v1607_v20 = vsel %vm3936_vm15, %v1602_v15, %v1604_v8  ;;  %v1608_v47 = vsel %vm3936_vm15, %v1604_v8, %v1606_v17  ;;  %v571_v48 = vpop.f32.mrf.mxu1  ;;  %vm3961_vm15 = vcmp.ne.s16.totalorder %v3277_v49, 0 }
 0x155   : > { %v1610_v22 = vand.u32 %v1607_v20, %v3197_v28  ;;  %v1613_v23 = vand.u32 %v1608_v47, %v3197_v28 }
 0x156   : > { %v572_v24 = vpop.f32.mrf.mxu1 }
 0x157   : > { %2989 = vmatmul.mubr.msk.bf16.vlgmr.msra.gmra.mxu0 %vm3954_vm12, %v3508_v9  ;;  %1629 = vmatprep.subr.bf16.mxu1 %v1613_v23  ;;  %vm3957_vm12 = vcmp.ne.s16.totalorder %v3161_v16, 0 }
 0x158   : > { %1630 = vmatpush1.bf16.msra.mxu1 %v1610_v22  ;;  %1733 = vmatprep.mubr.bf16.mxu0 %v3068_v1 }
 0x15b   : > { %2990 = vmatmul.mubr.msk.bf16.vlgmr.msra.gmra.mxu1 %vm3955_vm9, %v3513_v10  ;;  %vm3958_vm9 = vcmp.ne.s16.totalorder %v3286_v51, 0 }
 0x15c   : > { %1783 = vmatprep.mubr.bf16.mxu1 %v3068_v1 }
 0x160   : > { %v3578_v20 = vpop.permute.xlu0 %1092 }
 0x1c1   : > { %v517_v25 = vpop.f32.mrf.mxu0 }
 0x1c2   : > { %v568_v36 = vadd.f32 %v567_v3, %v517_v25 }
 0x1c3   : > { %v519_v27 = vpop.f32.mrf.mxu0 }
 0x1c4   : > { %v570_v44 = vadd.f32 %v569_v21, %v519_v27 }
 0x1c5   : > { %v521_v29 = vpop.f32.mrf.mxu0 }
 0x1c7   : > { %v522_v39 = vpop.f32.mrf.mxu0 }
 0x1d7   : > { %v655_v30 = vpop.f32.mrf.mxu0 }
 0x1d8   : > { %v662_v50 = vadd.f32 %v655_v30, %v568_v36 }
 0x1d9   : > { %v657_v28 = vpop.f32.mrf.mxu0 }
 0x1da   : > { %v663_v10 = vadd.f32 %v657_v28, %v570_v44 }
 0x1db   : > { %v659_v35 = vpop.f32.mrf.mxu0 }
 0x1dd   : > { %v660_v32 = vpop.f32.mrf.mxu0 }
 0x1df   : > { %v731_v34 = vpop.f32.mrf.mxu1  ;;  %v792_v9 = vpop.f32.mrf.mxu0 }
 0x1e0   : > { %v738_v57 = vadd.f32 %v731_v34, %v662_v50 }
 0x1e1   : > { %v733_v40 = vpop.f32.mrf.mxu1  ;;  %v794_v43 = vpop.f32.mrf.mxu0 }
 0x1e2   : > { %v739_v59 = vadd.f32 %v733_v40, %v663_v10  ;;  %v799_v63 = vadd.f32 %v792_v9, %v738_v57 }
 0x1e3   : > { %v735_v52 = vpop.f32.mrf.mxu1  ;;  %v796_v56 = vpop.f32.mrf.mxu0 }
 0x1e4   : > { %v800_v4 = vadd.f32 %v794_v43, %v739_v59 }
 0x1e5   : > { %v736_v6 = vpop.f32.mrf.mxu1  ;;  %v797_v58 = vpop.f32.mrf.mxu0 }
 0x1e7   : > { %v868_v61 = vpop.f32.mrf.mxu1  ;;  %v944_v62 = vpop.f32.mrf.mxu0 }
 0x1e8   : > { %v875_v19 = vadd.f32 %v868_v61, %v799_v63 }
 0x1e9   : > { %v870_v2 = vpop.f32.mrf.mxu1  ;;  %v946_v18 = vpop.f32.mrf.mxu0 }
 0x1ea   : > { %v876_v0 = vadd.f32 %v870_v2, %v800_v4  ;;  %v951_v12 = vadd.f32 %v944_v62, %v875_v19 }
 0x1eb   : > { %v872_v5 = vpop.f32.mrf.mxu1  ;;  %v948_v7 = vpop.f32.mrf.mxu0 }
 0x1ec   : > { %v952_v15 = vadd.f32 %v946_v18, %v876_v0 }
 0x1ed   : > { %v873_v8 = vpop.f32.mrf.mxu1  ;;  %v949_v11 = vpop.f32.mrf.mxu0 }
 0x1ef   : > { %v1005_v13 = vpop.f32.mrf.mxu1  ;;  %v1081_v3 = vpop.f32.mrf.mxu0 }
 0x1f0   : > { %v1012_v17 = vadd.f32 %v1005_v13, %v951_v12 }
 0x1f1   : > { %v1007_v47 = vpop.f32.mrf.mxu1  ;;  %v1083_v21 = vpop.f32.mrf.mxu0 }
 0x1f2   : > { %v1088_v22 = vadd.f32 %v1081_v3, %v1012_v17  ;;  %v1013_v23 = vadd.f32 %v1007_v47, %v952_v15 }
 0x1f3   : > { %v1009_v48 = vpop.f32.mrf.mxu1  ;;  %v1085_v24 = vpop.f32.mrf.mxu0 }
 0x1f4   : > { %v1089_v25 = vadd.f32 %v1083_v21, %v1013_v23  ;;  %v1095_v27 = vadd.f32 %v3578_v20, %v1088_v22 }
 0x1f5   : > { %v1010_v29 = vpop.f32.mrf.mxu1  ;;  %v1086_v39 = vpop.f32.mrf.mxu0 }
 0x1f6   : > { %v1097_v30 = vmax.f32 %v1095_v27, 0.0  ;;  %v1096_v28 = vadd.f32 %v3578_v20, %v1089_v25 }
 0x1f7   : > { %v1175_v35 = vpop.f32.mrf.mxu1  ;;  %v1222_v32 = vpop.f32.mrf.mxu0 }
 0x1f8   : > { %v1099_v34 = vpack.c.bf16 %v1097_v30, %v1097_v30  ;;  %v1098_v9 = vmax.f32 %v1096_v28, 0.0  ;;  %v1223_v62 = vadd.f32 %v1222_v32, %v1175_v35 }
 0x1f9   : > { %v1177_v36 = vpop.f32.mrf.mxu1  ;;  %v1224_v40 = vpop.f32.mrf.mxu0 }
 0x1fa   : > { %1666 = vrot.lane.b32.xlu1 %v1099_v34, %s3069_s15  ;;  %v1100_v50 = vpack.c.bf16 %v1098_v9, %v1098_v9  ;;  %v1225_v18 = vadd.f32 %v1224_v40, %v1177_v36 }
 0x1fb   : > { %v1179_v43 = vpop.f32.mrf.mxu1  ;;  %v1226_v44 = vpop.f32.mrf.mxu0 }
 0x1fd   : > { %v1180_v52 = vpop.f32.mrf.mxu1  ;;  %v1227_v56 = vpop.f32.mrf.mxu0 }
 0x1fe   : > { %1668 = vrot.lane.b32.xlu1 %v1100_v50, %s3069_s15 }
 0x1ff   : > { %v1283_v10 = vpop.f32.mrf.mxu1 }
 0x200   : > { %v1290_v5 = vadd.f32 %v1283_v10, %v1223_v62 }
 0x201   : > { %v1285_v57 = vpop.f32.mrf.mxu1 }
 0x202   : > { %v1291_v8 = vadd.f32 %v1285_v57, %v1225_v18 }
 0x203   : > { %v1287_v6 = vpop.f32.mrf.mxu1 }
 0x205   : > { %v1288_v58 = vpop.f32.mrf.mxu1 }
 0x207   : > { %v1346_v59 = vpop.f32.mrf.mxu0  ;;  %v1403_v61 = vpop.f32.mrf.mxu1 }
 0x208   : > { %v1353_v11 = vadd.f32 %v1346_v59, %v1290_v5 }
 0x209   : > { %v1348_v63 = vpop.f32.mrf.mxu0  ;;  %v1405_v2 = vpop.f32.mrf.mxu1 }
 0x20a   : > { %v1354_v13 = vadd.f32 %v1348_v63, %v1291_v8  ;;  %v1410_v17 = vadd.f32 %v1403_v61, %v1353_v11  ;;  %v397_v11 = vld [vmem:[%s3915_s4] sm:$0xf] }
 0x20b   : > { %v1350_v4 = vpop.f32.mrf.mxu0  ;;  %v1407_v19 = vpop.f32.mrf.mxu1 }
 0x20c   : > { %v1411_v22 = vadd.f32 %v1405_v2, %v1354_v13 }
 0x20d   : > { %v1351_v7 = vpop.f32.mrf.mxu0  ;;  %v1408_v0 = vpop.f32.mrf.mxu1 }
 0x20f   : > { %v1466_v12 = vpop.f32.mrf.mxu0 }
 0x210   : > { %v1529_v3 = vpop.f32.mrf.mxu1  ;;  %v1473_v23 = vadd.f32 %v1466_v12, %v1410_v17 }
 0x211   : > { %v1468_v15 = vpop.f32.mrf.mxu0 }
 0x212   : > { %v1531_v47 = vpop.f32.mrf.mxu1  ;;  %v1474_v25 = vadd.f32 %v1468_v15, %v1411_v22  ;;  %v1536_v39 = vadd.f32 %v1529_v3, %v1473_v23 }
 0x213   : > { %v1470_v21 = vpop.f32.mrf.mxu0 }
 0x214   : > { %v1533_v48 = vpop.f32.mrf.mxu1  ;;  %v1537_v28 = vadd.f32 %v1531_v47, %v1474_v25 }
 0x215   : > { %v1471_v24 = vpop.f32.mrf.mxu0 }
 0x216   : > { %v1534_v27 = vpop.f32.mrf.mxu1 }
 0x217   : > { %v1586_v29 = vpop.f32.mrf.mxu0 }
 0x218   : > { %v1593_v35 = vadd.f32 %v1586_v29, %v1536_v39 }
 0x219   : > { %v1588_v30 = vpop.f32.mrf.mxu0 }
 0x21a   : > { %v1594_v9 = vadd.f32 %v1588_v30, %v1537_v28 }
 0x21b   : > { %v1649_v32 = vpop.f32.mrf.mxu1  ;;  %v1590_v34 = vpop.f32.mrf.mxu0 }
 0x21c   : > { %v1656_v36 = vadd.f32 %v1649_v32, %v1593_v35 }
 0x21d   : > { %v1651_v40 = vpop.f32.mrf.mxu1  ;;  %v1591_v43 = vpop.f32.mrf.mxu0 }
 0x21e   : > { %v1658_v44 = vadd.f32 %v1656_v36, %v3578_v20  ;;  %v1657_v50 = vadd.f32 %v1651_v40, %v1594_v9 }
 0x21f   : > { %v1653_v52 = vpop.f32.mrf.mxu1 }
 0x220   : > { %v1660_v56 = vmax.f32 %v1658_v44, 0.0  ;;  %v1659_v10 = vadd.f32 %v1657_v50, %v3578_v20 }
 0x221   : > { %v1654_v57 = vpop.f32.mrf.mxu1 }
 0x222   : > { %v1662_v6 = vpack.c.bf16 %v1660_v56, %v1660_v56  ;;  %v1661_v58 = vmax.f32 %v1659_v10, 0.0 }
 0x224   : > { %v1663_v59 = vpack.c.bf16 %v1661_v58, %v1661_v58  ;;  %2244 = vrot.lane.b32.xlu0 %v1662_v6, %s3069_s15  ;;  %v398_v6 = vld [vmem:[%s3915_s4 + $0x4] sm:$0xf] }
 0x226   : > { %2246 = vrot.lane.b32.xlu1 %v1663_v59, %s3069_s15 }
 0x26c   : > { %v1667_v61 = vpop.permute.xlu1 %1666 }
 0x26d   : > { %v1673_v62 = vsel %vm429_vm6, 0, %v1667_v61 }
 0x26e   : > { %1924 = vrot.lane.b32.xlu1 %v1673_v62, %s3075_s24  ;;  %1682 = vrot.lane.b32.xlu0 %v1673_v62, %s3076_s25  ;;  %v1678_v20 = vsel %vm3956_vm5, %v1673_v62, 0  ;;  %v1792_v18 = vsel %vm594_vm11, %v1673_v62, 0  ;;  %v2050_v5 = vsel %vm883_vm7, %v1673_v62, 0  ;;  %v1858_v7 = vsel %vm670_vm13, %v1673_v62, 0 }
 0x26f   : > { %v1746_v19 = vsel %vm1694_vm3, %v1678_v20, 0  ;;  %v2176_v0 = vsel %vm3958_vm9, %v1673_v62, 0  ;;  %v1984_v8 = vsel %vm807_vm1, %v1673_v62, 0  ;;  %vm1690_vm5 = vcmask 64512  }
 0x270   : > { %v1669_v63 = vpop.permute.xlu1 %1668  ;;  %vm3960_vm9 = vcmp.ne.s16.totalorder %v3249_v42, 0 }
 0x271   : > { %v1670_v2 = vsel %vm429_vm6, %v1667_v61, %v1669_v63  ;;  %v1676_v12 = vsel %vm429_vm6, %v1669_v63, 0 }
 0x272   : > { %1798 = vrot.lane.b32.xlu1 %v1792_v18, %s3078_s28  ;;  %2116 = vrot.lane.b32.xlu0 %v1673_v62, %s3082_s13  ;;  %v1679_v4 = vsel %vm3957_vm12, %v1670_v2, 0  ;;  %vm3959_vm12 = vcmp.ne.s16.totalorder %v3207_v33, 0  ;;  %v1793_v3 = vsel %vm3960_vm9, %v1670_v2, 0  ;;  %v1859_v15 = vsel %vm3961_vm15, %v1670_v2, 0 }
 0x273   : > { %2993 = vmatprep.subr.msk.bf16.mxu1 %vm1694_vm3, %v1679_v4  ;;  %v1794_v13 = vsel %vm3959_vm12, %v1676_v12, 0  ;;  %v1860_v17 = vsel %vm3962_vm4, %v1676_v12, 0  ;;  %v1985_v47 = vsel %vm3963_vm2, %v1670_v2, 0  ;;  %vm3964_vm12 = vcmp.ne.s16.totalorder %v3243_v41, 0 }
 0x274   : > { %1766 = vmatpush1.bf16.msra.mxu1 %v1746_v19  ;;  %v1986_v21 = vsel %vm3964_vm12, %v1676_v12, 0  ;;  %vm3965_vm9 = vcmp.ne.s16.totalorder %v3259_v45, 0  ;;  %vm3966_vm15 = vcmp.ne.s16.totalorder %v3301_v54, 0  ;;  %vm3967_vm4 = vcmp.ne.s16.totalorder %v3303_v55, 0 }
 0x275   : > { %v2052_v22 = vsel %vm3965_vm9, %v1676_v12, 0  ;;  %v2051_v23 = vsel %vm3966_vm15, %v1670_v2, 0  ;;  %v2178_v48 = vsel %vm3967_vm4, %v1676_v12, 0  ;;  %vm3968_vm2 = vcmp.ne.s16.totalorder %v3324_v60, 0 }
 0x276   : > { %2056 = vrot.lane.b32.xlu1 %v2050_v5, %s3081_s12  ;;  %1864 = vrot.lane.b32.xlu0 %v1858_v7, %s3079_s29  ;;  %v2177_v24 = vsel %vm3968_vm2, %v1670_v2, 0  ;;  %vm3974_vm4 = vcmp.ne.s16.totalorder %v3286_v51, 0  ;;  %vm3975_vm2 = vcmp.ne.s16.totalorder %v3303_v55, 0  ;;  %v2822_v51 = vld [vmem:[%s3917_s6] sm:$0xff]  ;;  %v399_v7 = vld [vmem:[%s3915_s4 + $0x8] sm:$0xf] }
 0x277   : > { %2994 = vmatmul.mubr.msk.bf16.vlgmr.msra.gmra.mxu1 %vm1690_vm5, %v397_v11 }
 0x278   : > { %1913 = vmatprep.mubr.bf16.mxu1 %v3068_v1 }
 0x27a   : > { %2182 = vrot.lane.b32.xlu1 %v2176_v0, %s3083_s14  ;;  %1990 = vrot.lane.b32.xlu0 %v1984_v8, %s3080_s11 }
 0x27e   : > { %1684 = vrot.lane.b32.xlu1 %v1670_v2, %s3076_s25  ;;  %1686 = vrot.lane.b32.xlu0 %v1676_v12, %s3076_s25 }
 0x282   : > { %1928 = vrot.lane.b32.xlu1 %v1676_v12, %s3075_s24  ;;  %1926 = vrot.lane.b32.xlu0 %v1670_v2, %s3075_s24 }
 0x286   : > { %2118 = vrot.lane.b32.xlu1 %v1670_v2, %s3082_s13  ;;  %2120 = vrot.lane.b32.xlu0 %v1676_v12, %s3082_s13 }
 0x28a   : > { %1802 = vrot.lane.b32.xlu1 %v1794_v13, %s3078_s28  ;;  %1800 = vrot.lane.b32.xlu0 %v1793_v3, %s3078_s28 }
 0x28e   : > { %1866 = vrot.lane.b32.xlu1 %v1859_v15, %s3079_s29  ;;  %1868 = vrot.lane.b32.xlu0 %v1860_v17, %s3079_s29  ;;  %v400_v15 = vld [vmem:[%s3915_s4 + $0xc] sm:$0xf] }
 0x292   : > { %1992 = vrot.lane.b32.xlu1 %v1985_v47, %s3080_s11  ;;  %1994 = vrot.lane.b32.xlu0 %v1986_v21, %s3080_s11 }
 0x296   : > { %2060 = vrot.lane.b32.xlu1 %v2052_v22, %s3081_s12  ;;  %2058 = vrot.lane.b32.xlu0 %v2051_v23, %s3081_s12  ;;  %v2245_v25 = vpop.permute.xlu0 %2244 }
 0x297   : > { %v3657_v27 = vsel %vm429_vm6, 0, %v2245_v25 }
 0x298   : > { %v2438_v29 = vsel %vm670_vm13, %v3657_v27, 0  ;;  %v2372_v39 = vsel %vm594_vm11, %v3657_v27, 0  ;;  %v2564_v30 = vsel %vm807_vm1, %v3657_v27, 0  ;;  %v2630_v28 = vsel %vm883_vm7, %v3657_v27, 0  ;;  %v2247_v35 = vpop.permute.xlu1 %2246 }
 0x299   : > { %v3680_v26 = vsel %vm429_vm6, %v2245_v25, %v2247_v35  ;;  %v2254_v31 = vsel %vm429_vm6, %v2247_v35, 0  ;;  %vm3969_vm11 = vcmp.ne.s16.totalorder %v3207_v33, 0  ;;  %vm3970_vm13 = vcmp.ne.s16.totalorder %v3249_v42, 0 }
 0x29a   : > { %2186 = vrot.lane.b32.xlu1 %v2178_v48, %s3083_s14  ;;  %2184 = vrot.lane.b32.xlu0 %v2177_v24, %s3083_s14  ;;  %v2374_v38 = vsel %vm3969_vm11, %v2254_v31, 0  ;;  %v2373_v46 = vsel %vm3970_vm13, %v3680_v26, 0  ;;  %vm3971_vm6 = vcmp.ne.s16.totalorder %v3277_v49, 0  ;;  %vm3972_vm1 = vcmp.ne.s16.totalorder %v3226_v37, 0  ;;  %v401_v24 = vld [vmem:[%s3915_s4 + $0x10] sm:$0xf] }
 0x29b   : > { %v2439_v32 = vsel %vm3971_vm6, %v3680_v26, 0  ;;  %v2440_v34 = vsel %vm3972_vm1, %v2254_v31, 0  ;;  %vm3973_vm7 = vcmp.ne.s16.totalorder %v3297_v53, 0  ;;  %v2566_v42 = vsel %vm3964_vm12, %v2254_v31, 0 }
 0x29c   : > { %v2565_v33 = vsel %vm3973_vm7, %v3680_v26, 0  ;;  %v2632_v37 = vsel %vm3965_vm9, %v2254_v31, 0  ;;  %v2631_v49 = vsel %vm3966_vm15, %v3680_v26, 0  ;;  %v2756_v41 = vsel %vm3974_vm4, %v3657_v27, 0 }
 0x29d   : > { %v2758_v45 = vsel %vm3975_vm2, %v2254_v31, 0  ;;  %vm3976_vm11 = vcmp.ne.s16.totalorder %v3324_v60, 0  ;;  %vm3977_vm13 = vcmask 1039360   ;;  %vm3979_vm1 = vcmask 777216  }
 0x29e   : > { %2504 = vrot.lane.b32.xlu1 %v3657_v27, %s3075_s24  ;;  %2312 = vrot.lane.b32.xlu0 %v3657_v27, %s3076_s25  ;;  %v2757_v53 = vsel %vm3976_vm11, %v3680_v26, 0  ;;  %vm3978_vm6 = vmmov %vm3977_vm13  ;;  %vm3980_vm7 = vcmask 785408   ;;  %vm3983_vm15 = vcmask 769024   ;;  %vm3985_vm2 = vcmp.ne.s16.totalorder %v3161_v16, 0  ;;  %v404_v16 = vld [vmem:[%s3915_s4 + $0x1c] sm:$0xf] }
 0x29f   : > { %vm3981_vm12 = vmmov %vm3980_vm7  ;;  %vm3986_vm11 = vcmp.ne.s16.totalorder %v3158_v14, 0  ;;  %v406_v14 = vld [vmem:[%s3916_s5] sm:$0xf] }
 0x2a0   : > { %vm3982_vm9 = vmmov %vm3979_vm1 }
 0x2a1   : > { %vm3984_vm4 = vmmov %vm3983_vm15 }
 0x2a2   : > { %2444 = vrot.lane.b32.xlu0 %v2438_v29, %s3079_s29  ;;  %2378 = vrot.lane.b32.xlu1 %v2372_v39, %s3078_s28 }
 0x2a6   : > { %2570 = vrot.lane.b32.xlu0 %v2564_v30, %s3080_s11  ;;  %2636 = vrot.lane.b32.xlu1 %v2630_v28, %s3081_s12 }
 0x2aa   : > { %2316 = vrot.lane.b32.xlu0 %v2254_v31, %s3076_s25  ;;  %2314 = vrot.lane.b32.xlu1 %v3680_v26, %s3076_s25 }
 0x2ae   : > { %2506 = vrot.lane.b32.xlu0 %v3680_v26, %s3075_s24  ;;  %2508 = vrot.lane.b32.xlu1 %v2254_v31, %s3075_s24 }
 0x2b2   : > { %2382 = vrot.lane.b32.xlu1 %v2374_v38, %s3078_s28  ;;  %2380 = vrot.lane.b32.xlu0 %v2373_v46, %s3078_s28  ;;  %s3033_s28 = sshll.u32 %s3995_s10, 4 }
 0x2b6   : > { %2446 = vrot.lane.b32.xlu1 %v2439_v32, %s3079_s29  ;;  %2448 = vrot.lane.b32.xlu0 %v2440_v34, %s3079_s29 }
 0x2ba   : > { %2698 = vrot.lane.b32.xlu1 %v3680_v26, %s3082_s13  ;;  %2696 = vrot.lane.b32.xlu0 %v3657_v27, %s3082_s13 }
 0x2be   : > { %2572 = vrot.lane.b32.xlu1 %v2565_v33, %s3080_s11  ;;  %2574 = vrot.lane.b32.xlu0 %v2566_v42, %s3080_s11  ;;  %v2257_v42 = vsel %vm3985_vm2, %v3680_v26, 0  ;;  %v2256_v26 = vsel %vm3986_vm11, %v3657_v27, 0 }
 0x2c2   : > { %2640 = vrot.lane.b32.xlu1 %v2632_v37, %s3081_s12  ;;  %2638 = vrot.lane.b32.xlu0 %v2631_v49, %s3081_s12  ;;  %v403_v37 = vld [vmem:[%s3915_s4 + $0x18] sm:$0xf]  ;;  %s352_s12 = scalar_lea.vmem %s3920_s9, %s3033_s28 }
 0x2c6   : > { %2762 = vrot.lane.b32.xlu1 %v2756_v41, %s3083_s14  ;;  %2700 = vrot.lane.b32.xlu0 %v2254_v31, %s3082_s13  ;;  %v402_v31 = vld [vmem:[%s3915_s4 + $0x14] sm:$0xf] }
 0x2ca   : > { %2766 = vrot.lane.b32.xlu1 %v2758_v45, %s3083_s14  ;;  %2764 = vrot.lane.b32.xlu0 %v2757_v53, %s3083_s14 }
 0x2ce   : > { %2825 = vperm.xlu0 %3058, %v2822_v51  }
 0x2e0   : > { %v1925_v54 = vpop.permute.xlu1 %1924  ;;  %v1683_v9 = vpop.permute.xlu0 %1682 }
 0x2e4   : > { %v1799_v36 = vpop.permute.xlu1 %1798  ;;  %v2117_v40 = vpop.permute.xlu0 %2116 }
 0x2e8   : > { %v2057_v43 = vpop.permute.xlu1 %2056  ;;  %v1865_v55 = vpop.permute.xlu0 %1864 }
 0x2ec   : > { %v3736_v44 = vpop.permute.xlu1 %2182  ;;  %v1991_v50 = vpop.permute.xlu0 %1990 }
 0x2f0   : > { %v1685_v60 = vpop.permute.xlu1 %1684  ;;  %v1687_v52 = vpop.permute.xlu0 %1686 }
 0x2f1   : > { %v1688_v56 = vsel %vm3977_vm13, %v1683_v9, %v1685_v60  ;;  %v1689_v10 = vsel %vm3978_vm6, %v1685_v60, %v1687_v52  ;;  %v405_v9 = vld [vmem:[%s3915_s4 + $0x20] sm:$0xf]  ;;  %vm3987_vm13 = vmmov %vm3978_vm6  ;;  %v407_v60 = vld [vmem:[%s3916_s5 + $0x4] sm:$0xf] }
 0x2f2   : > { %v1696_v57 = vsel %vm1694_vm3, %v1688_v56, 0  ;;  %2991 = vmatprep.subr.msk.bf16.mxu0 %vm1694_vm3, %v1689_v10 }
 0x2f3   : > { %1716 = vmatpush1.bf16.msra.mxu0 %v1696_v57 }
 0x2f4   : > { %v1929_v58 = vpop.permute.xlu1 %1928  ;;  %v1927_v59 = vpop.permute.xlu0 %1926 }
 0x2f5   : > { %v1930_v19 = vsel %vm746_vm10, %v1925_v54, %v1927_v59  ;;  %v1931_v5 = vsel %vm746_vm10, %v1927_v59, %v1929_v58  ;;  %v2262_v54 = vsel %vm1694_vm3, %v2256_v26, 0 }
 0x2f6   : > { %2992 = vmatmul.mubr.msk.bf16.vlgmr.msra.gmra.mxu0 %vm1690_vm5, %v398_v6  ;;  %v1936_v13 = vsel %vm1694_vm3, %v1930_v19, 0 }
 0x2f7   : > { %1847 = vmatprep.mubr.bf16.mxu0 %v3068_v1 }
 0x2f8   : > { %v2119_v61 = vpop.permute.xlu1 %2118  ;;  %v2121_v62 = vpop.permute.xlu0 %2120 }
 0x2f9   : > { %v2123_v48 = vsel %vm3979_vm1, %v2119_v61, %v2121_v62  ;;  %v2122_v35 = vsel %vm3982_vm9, %v2117_v40, %v2119_v61 }
 0x2fa   : > { %v2128_v34 = vsel %vm1694_vm3, %v2122_v35, 0 }
 0x2fc   : > { %v1803_v63 = vpop.permute.xlu1 %1802  ;;  %v1801_v20 = vpop.permute.xlu0 %1800 }
 0x2fd   : > { %v1804_v2 = vsel %vm609_vm14, %v1799_v36, %v1801_v20  ;;  %v1805_v18 = vsel %vm609_vm14, %v1801_v20, %v1803_v63  ;;  %v408_v63 = vld [vmem:[%s3916_s5 + $0x8] sm:$0xf] }
 0x2fe   : > { %v1810_v4 = vsel %vm1694_vm3, %v1804_v2, 0  ;;  %2995 = vmatprep.subr.msk.bf16.mxu0 %vm1694_vm3, %v1805_v18 }
 0x2ff   : > { %1830 = vmatpush1.bf16.msra.mxu0 %v1810_v4 }
 0x300   : > { %v1867_v0 = vpop.permute.xlu1 %1866  ;;  %2999 = vmatprep.subr.msk.bf16.mxu0 %vm1694_vm3, %v1931_v5  ;;  %v1869_v8 = vpop.permute.xlu0 %1868 }
 0x301   : > { %v1870_v11 = vsel %vm685_vm0, %v1865_v55, %v1867_v0  ;;  %v1871_v12 = vsel %vm685_vm0, %v1867_v0, %v1869_v8 }
 0x302   : > { %v1876_v3 = vsel %vm1694_vm3, %v1870_v11, 0  ;;  %2996 = vmatmul.mubr.msk.bf16.vlgmr.msra.gmra.mxu0 %vm1690_vm5, %v399_v7  ;;  %2997 = vmatprep.subr.msk.bf16.mxu1 %vm1694_vm3, %v1871_v12  ;;  %v409_v7 = vld [vmem:[%s3916_s5 + $0xc] sm:$0xf]  ;;  %v410_v11 = vld [vmem:[%s3916_s5 + $0x10] sm:$0xf] }
 0x303   : > { %1896 = vmatpush1.bf16.msra.mxu1 %v1876_v3  ;;  %1956 = vmatpush1.bf16.msra.mxu0 %v1936_v13 }
 0x304   : > { %v1993_v17 = vpop.permute.xlu1 %1992  ;;  %v1995_v47 = vpop.permute.xlu0 %1994  ;;  %1973 = vmatprep.mubr.bf16.mxu0 %v3068_v1 }
 0x305   : > { %v1996_v21 = vsel %vm822_vm8, %v1991_v50, %v1993_v17  ;;  %v1997_v22 = vsel %vm822_vm8, %v1993_v17, %v1995_v47  ;;  %v411_v47 = vld [vmem:[%s3916_s5 + $0x14] sm:$0xf] }
 0x306   : > { %v2002_v23 = vsel %vm1694_vm3, %v1996_v21, 0  ;;  %2998 = vmatmul.mubr.msk.bf16.vlgmr.msra.gmra.mxu1 %vm1690_vm5, %v400_v15  ;;  %3001 = vmatprep.subr.msk.bf16.mxu1 %vm1694_vm3, %v1997_v22 }
 0x307   : > { %2022 = vmatpush1.bf16.msra.mxu1 %v2002_v23  ;;  %2039 = vmatprep.mubr.bf16.mxu1 %v3068_v1 }
 0x308   : > { %v2061_v25 = vpop.permute.xlu1 %2060  ;;  %3005 = vmatprep.subr.msk.bf16.mxu1 %vm1694_vm3, %v2123_v48  ;;  %v2059_v29 = vpop.permute.xlu0 %2058 }
 0x309   : > { %v2062_v39 = vsel %vm3980_vm7, %v2057_v43, %v2059_v29  ;;  %v2063_v30 = vsel %vm3981_vm12, %v2059_v29, %v2061_v25  ;;  %v412_v29 = vld [vmem:[%s3916_s5 + $0x18] sm:$0xf] }
 0x30a   : > { %v2068_v28 = vsel %vm1694_vm3, %v2062_v39, 0  ;;  %3000 = vmatmul.mubr.msk.bf16.vlgmr.msra.gmra.mxu0 %vm1690_vm5, %v401_v24  ;;  %3003 = vmatprep.subr.msk.bf16.mxu0 %vm1694_vm3, %v2063_v30 }
 0x30b   : > { %2088 = vmatpush1.bf16.msra.mxu0 %v2068_v28  ;;  %2105 = vmatprep.mubr.bf16.mxu0 %v3068_v1 }
 0x30c   : > { %v2187_v38 = vpop.permute.xlu1 %2186  ;;  %v2185_v46 = vpop.permute.xlu0 %2184 }
 0x30d   : > { %v2189_v32 = vsel %vm3983_vm15, %v2185_v46, %v2187_v38  ;;  %v2188_v33 = vsel %vm3984_vm4, %v3736_v44, %v2185_v46 }
 0x30e   : > { %3002 = vmatmul.mubr.msk.bf16.vlgmr.msra.gmra.mxu1 %vm1690_vm5, %v402_v31  ;;  %3007 = vmatprep.subr.msk.bf16.mxu0 %vm1694_vm3, %v2189_v32  ;;  %v2194_v45 = vsel %vm1694_vm3, %v2188_v33, 0  ;;  %v413_v31 = vld [vmem:[%s3916_s5 + $0x1c] sm:$0xf] }
 0x30f   : > { %2148 = vmatpush1.bf16.msra.mxu1 %v2128_v34  ;;  %2165 = vmatprep.mubr.bf16.mxu1 %v3068_v1 }
 0x310   : > { %3009 = vmatprep.subr.msk.bf16.mxu1 %vm1694_vm3, %v2257_v42  ;;  %v2505_v49 = vpop.permute.xlu1 %2504  ;;  %v2313_v41 = vpop.permute.xlu0 %2312 }
 0x312   : > { %3004 = vmatmul.mubr.msk.bf16.vlgmr.msra.gmra.mxu0 %vm1690_vm5, %v403_v37 }
 0x313   : > { %2214 = vmatpush1.bf16.msra.mxu0 %v2194_v45  ;;  %2231 = vmatprep.mubr.bf16.mxu0 %v3068_v1 }
 0x314   : > { %v2379_v53 = vpop.permute.xlu1 %2378  ;;  %v2445_v51 = vpop.permute.xlu0 %2444 }
 0x316   : > { %3006 = vmatmul.mubr.msk.bf16.vlgmr.msra.gmra.mxu1 %vm1690_vm5, %v404_v16  ;;  %v2835_v16 = vld [vmem:[%s3919_s8] sm:$0xff] }
 0x317   : > { %2282 = vmatpush1.bf16.msra.mxu1 %v2262_v54  ;;  %2299 = vmatprep.mubr.bf16.mxu1 %v3068_v1 }
 0x318   : > { %v2637_v36 = vpop.permute.xlu1 %2636  ;;  %v2571_v40 = vpop.permute.xlu0 %2570  ;;  %2838 = vperm.xlu1 %3059, %v2835_v16  }
 0x31a   : > { %3008 = vmatmul.mubr.msk.bf16.vlgmr.msra.gmra.mxu0 %vm1690_vm5, %v405_v9 }
 0x31b   : > { %2361 = vmatprep.mubr.bf16.mxu0 %v3068_v1 }
 0x31c   : > { %v2315_v27 = vpop.permute.xlu1 %2314  ;;  %v2317_v43 = vpop.permute.xlu0 %2316 }
 0x31d   : > { %v2318_v55 = vsel %vm3987_vm13, %v2313_v41, %v2315_v27  ;;  %v2319_v44 = vsel %vm3978_vm6, %v2315_v27, %v2317_v43 }
 0x31e   : > { %v2324_v50 = vsel %vm1694_vm3, %v2318_v55, 0  ;;  %3010 = vmatmul.mubr.msk.bf16.vlgmr.msra.gmra.mxu1 %vm1690_vm5, %v406_v14  ;;  %3011 = vmatprep.subr.msk.bf16.mxu0 %vm1694_vm3, %v2319_v44 }
 0x31f   : > { %2344 = vmatpush1.bf16.msra.mxu0 %v2324_v50  ;;  %2427 = vmatprep.mubr.bf16.mxu1 %v3068_v1 }
 0x320   : > { %v2509_v52 = vpop.permute.xlu1 %2508  ;;  %v2507_v56 = vpop.permute.xlu0 %2506 }
 0x321   : > { %v2510_v61 = vsel %vm746_vm10, %v2505_v49, %v2507_v56  ;;  %v2511_v62 = vsel %vm746_vm10, %v2507_v56, %v2509_v52  ;;  %vm3989_vm10 = vmmov %vm3980_vm7  ;;  %v414_v49 = vld [vmem:[%s3916_s5 + $0x20] sm:$0xf] }
 0x322   : > { %3012 = vmatmul.mubr.msk.bf16.vlgmr.msra.gmra.mxu0 %vm1690_vm5, %v407_v60  ;;  %v2516_v19 = vsel %vm1694_vm3, %v2510_v61, 0 }
 0x323   : > { %2493 = vmatprep.mubr.bf16.mxu0 %v3068_v1 }
 0x324   : > { %v2383_v10 = vpop.permute.xlu1 %2382  ;;  %v2381_v57 = vpop.permute.xlu0 %2380 }
 0x325   : > { %v2384_v6 = vsel %vm609_vm14, %v2379_v53, %v2381_v57  ;;  %v2385_v58 = vsel %vm609_vm14, %v2381_v57, %v2383_v10  ;;  %vm3988_vm14 = vmmov %vm3980_vm7 }
 0x326   : > { %v2390_v59 = vsel %vm1694_vm3, %v2384_v6, 0  ;;  %3013 = vmatprep.subr.msk.bf16.mxu1 %vm1694_vm3, %v2385_v58 }
 0x327   : > { %2410 = vmatpush1.bf16.msra.mxu1 %v2390_v59 }
 0x328   : > { %v2447_v20 = vpop.permute.xlu1 %2446  ;;  %3017 = vmatprep.subr.msk.bf16.mxu1 %vm1694_vm3, %v2511_v62  ;;  %v2449_v2 = vpop.permute.xlu0 %2448 }
 0x329   : > { %v2450_v18 = vsel %vm685_vm0, %v2445_v51, %v2447_v20  ;;  %v2451_v4 = vsel %vm685_vm0, %v2447_v20, %v2449_v2  ;;  %vm3991_vm0 = vmmov %vm3979_vm1 }
 0x32a   : > { %v2456_v5 = vsel %vm1694_vm3, %v2450_v18, 0  ;;  %3014 = vmatmul.mubr.msk.bf16.vlgmr.msra.gmra.mxu1 %vm1690_vm5, %v408_v63  ;;  %3015 = vmatprep.subr.msk.bf16.mxu0 %vm1694_vm3, %v2451_v4 }
 0x32b   : > { %2476 = vmatpush1.bf16.msra.mxu0 %v2456_v5  ;;  %2536 = vmatpush1.bf16.msra.mxu1 %v2516_v19 }
 0x32c   : > { %v2699_v0 = vpop.permute.xlu1 %2698  ;;  %v2697_v8 = vpop.permute.xlu0 %2696  ;;  %2553 = vmatprep.mubr.bf16.mxu1 %v3068_v1 }
 0x32e   : > { %3016 = vmatmul.mubr.msk.bf16.vlgmr.msra.gmra.mxu0 %vm1690_vm5, %v409_v7 }
 0x32f   : > { %2619 = vmatprep.mubr.bf16.mxu0 %v3068_v1 }
 0x330   : > { %v2573_v12 = vpop.permute.xlu1 %2572  ;;  %v2575_v13 = vpop.permute.xlu0 %2574 }
 0x331   : > { %v2576_v3 = vsel %vm822_vm8, %v2571_v40, %v2573_v12  ;;  %v2577_v15 = vsel %vm822_vm8, %v2573_v12, %v2575_v13  ;;  %vm3990_vm8 = vmmov %vm3979_vm1 }
 0x332   : > { %v2582_v17 = vsel %vm1694_vm3, %v2576_v3, 0  ;;  %3018 = vmatmul.mubr.msk.bf16.vlgmr.msra.gmra.mxu1 %vm1690_vm5, %v410_v11  ;;  %3019 = vmatprep.subr.msk.bf16.mxu0 %vm1694_vm3, %v2577_v15  ;;  %v2702_v25 = vsel %vm3990_vm8, %v2697_v8, %v2699_v0  ;;  %vm3992_vm1 = vmmov %vm3984_vm4 }
 0x333   : > { %2602 = vmatpush1.bf16.msra.mxu0 %v2582_v17  ;;  %2685 = vmatprep.mubr.bf16.mxu1 %v3068_v1  ;;  %v2708_v35 = vsel %vm1694_vm3, %v2702_v25, 0  ;;  %vm3993_vm7 = vmmov %vm3992_vm1 }
 0x334   : > { %v2641_v21 = vpop.permute.xlu1 %2640  ;;  %v2639_v22 = vpop.permute.xlu0 %2638 }
 0x335   : > { %v2642_v23 = vsel %vm3988_vm14, %v2637_v36, %v2639_v22  ;;  %v2643_v48 = vsel %vm3989_vm10, %v2639_v22, %v2641_v21 }
 0x336   : > { %v2648_v24 = vsel %vm1694_vm3, %v2642_v23, 0  ;;  %3020 = vmatmul.mubr.msk.bf16.vlgmr.msra.gmra.mxu0 %vm1690_vm5, %v411_v47  ;;  %3021 = vmatprep.subr.msk.bf16.mxu1 %vm1694_vm3, %v2643_v48 }
 0x337   : > { %2668 = vmatpush1.bf16.msra.mxu1 %v2648_v24  ;;  %2745 = vmatprep.mubr.bf16.mxu0 %v3068_v1  ;;  %v1785_v38 = vpop.f32.mrf.mxu1 }
 0x338   : > { %v2763_v39 = vpop.permute.xlu1 %2762  ;;  %v2701_v30 = vpop.permute.xlu0 %2700 }
 0x339   : > { %v2703_v28 = vsel %vm3991_vm0, %v2699_v0, %v2701_v30  ;;  %v1787_v42 = vpop.f32.mrf.mxu1 }
 0x33a   : > { %3022 = vmatmul.mubr.msk.bf16.vlgmr.msra.gmra.mxu1 %vm1690_vm5, %v412_v29  ;;  %3023 = vmatprep.subr.msk.bf16.mxu0 %vm1694_vm3, %v2703_v28 }
 0x33b   : > { %2728 = vmatpush1.bf16.msra.mxu0 %v2708_v35  ;;  %2811 = vmatprep.mubr.bf16.mxu1 %v3068_v1  ;;  %v1789_v41 = vpop.f32.mrf.mxu1 }
 0x33c   : > { %v2767_v46 = vpop.permute.xlu1 %2766  ;;  %v2765_v32 = vpop.permute.xlu0 %2764 }
 0x33d   : > { %v2768_v34 = vsel %vm3992_vm1, %v2763_v39, %v2765_v32  ;;  %v2769_v33 = vsel %vm3993_vm7, %v2765_v32, %v2767_v46  ;;  %v1790_v45 = vpop.f32.mrf.mxu1 }
 0x33e   : > { %v2774_v37 = vsel %vm1694_vm3, %v2768_v34, 0  ;;  %3024 = vmatmul.mubr.msk.bf16.vlgmr.msra.gmra.mxu0 %vm1690_vm5, %v413_v31  ;;  %3025 = vmatprep.subr.msk.bf16.mxu1 %vm1694_vm3, %v2769_v33 }
 0x33f   : > { %2794 = vmatpush1.bf16.msra.mxu1 %v2774_v37  ;;  %2882 = vmatprep.mubr.bf16.mxu0 %v3068_v1 }
 0x342   : > { %3026 = vmatmul.mubr.msk.bf16.vlgmr.msra.gmra.mxu1 %vm1690_vm5, %v414_v49 }
 0x3b6   : > { %v1735_v26 = vpop.f32.mrf.mxu0 }
 0x3b7   : > { %v1786_v11 = vadd.f32 %v1785_v38, %v1735_v26 }
 0x3b8   : > { %v1737_v53 = vpop.f32.mrf.mxu0 }
 0x3b9   : > { %v1788_v17 = vadd.f32 %v1787_v42, %v1737_v53 }
 0x3ba   : > { %v1739_v51 = vpop.f32.mrf.mxu0 }
 0x3bc   : > { %v1740_v54 = vpop.f32.mrf.mxu0 }
 0x3c2   : > { %v1849_v9 = vpop.f32.mrf.mxu0 }
 0x3c3   : > { %v1856_v47 = vadd.f32 %v1849_v9, %v1786_v11 }
 0x3c4   : > { %v1851_v36 = vpop.f32.mrf.mxu0 }
 0x3c5   : > { %v1857_v22 = vadd.f32 %v1851_v36, %v1788_v17 }
 0x3c6   : > { %v1853_v40 = vpop.f32.mrf.mxu0  ;;  %v1915_v14 = vpop.f32.mrf.mxu1 }
 0x3c7   : > { %v1922_v23 = vadd.f32 %v1915_v14, %v1856_v47 }
 0x3c8   : > { %v1854_v27 = vpop.f32.mrf.mxu0  ;;  %v1917_v43 = vpop.f32.mrf.mxu1 }
 0x3c9   : > { %v1923_v24 = vadd.f32 %v1917_v43, %v1857_v22 }
 0x3ca   : > { %v1919_v55 = vpop.f32.mrf.mxu1  ;;  %v1975_v1 = vpop.f32.mrf.mxu0 }
 0x3cb   : > { %v1982_v25 = vadd.f32 %v1975_v1, %v1922_v23 }
 0x3cc   : > { %v1920_v44 = vpop.f32.mrf.mxu1  ;;  %v1977_v50 = vpop.f32.mrf.mxu0 }
 0x3cd   : > { %v1983_v39 = vadd.f32 %v1977_v50, %v1923_v24 }
 0x3ce   : > { %v1979_v60 = vpop.f32.mrf.mxu0  ;;  %v2041_v52 = vpop.f32.mrf.mxu1 }
 0x3cf   : > { %v2048_v30 = vadd.f32 %v2041_v52, %v1982_v25  ;;  %v2834_v25 = vld [vmem:[%s3918_s7] sm:$0xf] }
 0x3d0   : > { %v1980_v56 = vpop.f32.mrf.mxu0  ;;  %v2043_v10 = vpop.f32.mrf.mxu1 }
 0x3d1   : > { %v2049_v35 = vadd.f32 %v2043_v10, %v1983_v39 }
 0x3d2   : > { %v2045_v57 = vpop.f32.mrf.mxu1  ;;  %v2107_v6 = vpop.f32.mrf.mxu0 }
 0x3d3   : > { %v2114_v31 = vadd.f32 %v2107_v6, %v2048_v30 }
 0x3d4   : > { %v2046_v58 = vpop.f32.mrf.mxu1  ;;  %v2109_v59 = vpop.f32.mrf.mxu0 }
 0x3d5   : > { %v2115_v32 = vadd.f32 %v2109_v59, %v2049_v35 }
 0x3d6   : > { %v2111_v61 = vpop.f32.mrf.mxu0  ;;  %v2167_v62 = vpop.f32.mrf.mxu1 }
 0x3d7   : > { %v2174_v34 = vadd.f32 %v2167_v62, %v2114_v31 }
 0x3d8   : > { %v2112_v63 = vpop.f32.mrf.mxu0  ;;  %v2169_v20 = vpop.f32.mrf.mxu1 }
 0x3d9   : > { %v2175_v42 = vadd.f32 %v2169_v20, %v2115_v32 }
 0x3da   : > { %v2171_v2 = vpop.f32.mrf.mxu1  ;;  %v2233_v18 = vpop.f32.mrf.mxu0 }
 0x3db   : > { %v2240_v49 = vadd.f32 %v2233_v18, %v2174_v34 }
 0x3dc   : > { %v2172_v4 = vpop.f32.mrf.mxu1  ;;  %v2235_v19 = vpop.f32.mrf.mxu0 }
 0x3dd   : > { %v2241_v16 = vadd.f32 %v2235_v19, %v2175_v42 }
 0x3de   : > { %v2237_v5 = vpop.f32.mrf.mxu0  ;;  %v2301_v7 = vpop.f32.mrf.mxu1 }
 0x3df   : > { %v2308_v26 = vadd.f32 %v2301_v7, %v2240_v49  ;;  %v2826_v7 = vpop.permute.xlu0 %2825 }
 0x3e0   : > { %v2238_v0 = vpop.f32.mrf.mxu0  ;;  %v2303_v8 = vpop.f32.mrf.mxu1 }
 0x3e1   : > { %v2309_v54 = vadd.f32 %v2303_v8, %v2241_v16 }
 0x3e2   : > { %v2305_v12 = vpop.f32.mrf.mxu1  ;;  %v2363_v13 = vpop.f32.mrf.mxu0 }
 0x3e3   : > { %v2370_v9 = vadd.f32 %v2363_v13, %v2308_v26 }
 0x3e4   : > { %v2306_v3 = vpop.f32.mrf.mxu1  ;;  %v2365_v15 = vpop.f32.mrf.mxu0 }
 0x3e5   : > { %v2371_v14 = vadd.f32 %v2365_v15, %v2309_v54 }
 0x3e6   : > { %v2367_v21 = vpop.f32.mrf.mxu0 }
 0x3e8   : > { %v2368_v48 = vpop.f32.mrf.mxu0 }
 0x3ea   : > { %v2429_v29 = vpop.f32.mrf.mxu1 }
 0x3eb   : > { %v2436_v27 = vadd.f32 %v2429_v29, %v2370_v9  ;;  %v2839_v29 = vpop.permute.xlu1 %2838 }
 0x3ec   : > { %v2431_v28 = vpop.f32.mrf.mxu1 }
 0x3ed   : > { %v2437_v1 = vadd.f32 %v2431_v28, %v2371_v14 }
 0x3ee   : > { %v2433_v46 = vpop.f32.mrf.mxu1  ;;  %v2495_v38 = vpop.f32.mrf.mxu0 }
 0x3ef   : > { %v2502_v44 = vadd.f32 %v2495_v38, %v2436_v27 }
 0x3f0   : > { %v2434_v33 = vpop.f32.mrf.mxu1  ;;  %v2497_v37 = vpop.f32.mrf.mxu0 }
 0x3f1   : > { %v2503_v52 = vadd.f32 %v2497_v37, %v2437_v1 }
 0x3f2   : > { %v2499_v41 = vpop.f32.mrf.mxu0  ;;  %v2555_v45 = vpop.f32.mrf.mxu1 }
 0x3f3   : > { %v2562_v56 = vadd.f32 %v2555_v45, %v2502_v44 }
 0x3f4   : > { %v2500_v53 = vpop.f32.mrf.mxu0  ;;  %v2557_v51 = vpop.f32.mrf.mxu1 }
 0x3f5   : > { %v2563_v6 = vadd.f32 %v2557_v51, %v2503_v52 }
 0x3f6   : > { %v2559_v36 = vpop.f32.mrf.mxu1  ;;  %v2621_v40 = vpop.f32.mrf.mxu0 }
 0x3f7   : > { %v2628_v58 = vadd.f32 %v2621_v40, %v2562_v56 }
 0x3f8   : > { %v2560_v43 = vpop.f32.mrf.mxu1  ;;  %v2623_v55 = vpop.f32.mrf.mxu0 }
 0x3f9   : > { %v2629_v62 = vadd.f32 %v2623_v55, %v2563_v6 }
 0x3fa   : > { %v2625_v50 = vpop.f32.mrf.mxu0  ;;  %v2687_v60 = vpop.f32.mrf.mxu1 }
 0x3fb   : > { %v2694_v63 = vadd.f32 %v2687_v60, %v2628_v58 }
 0x3fc   : > { %v2626_v10 = vpop.f32.mrf.mxu0  ;;  %v2689_v57 = vpop.f32.mrf.mxu1 }
 0x3fd   : > { %v2695_v18 = vadd.f32 %v2689_v57, %v2629_v62 }
 0x3fe   : > { %v2691_v59 = vpop.f32.mrf.mxu1  ;;  %v2747_v61 = vpop.f32.mrf.mxu0 }
 0x3ff   : > { %v2754_v4 = vadd.f32 %v2747_v61, %v2694_v63 }
 0x400   : > { %v2692_v20 = vpop.f32.mrf.mxu1  ;;  %v2749_v2 = vpop.f32.mrf.mxu0 }
 0x401   : > { %v2755_v0 = vadd.f32 %v2749_v2, %v2695_v18 }
 0x402   : > { %v2751_v19 = vpop.f32.mrf.mxu0  ;;  %v2813_v5 = vpop.f32.mrf.mxu1 }
 0x403   : > { %v2820_v8 = vadd.f32 %v2813_v5, %v2754_v4 }
 0x404   : > { %v2752_v11 = vpop.f32.mrf.mxu0  ;;  %v2815_v12 = vpop.f32.mrf.mxu1 }
 0x405   : > { %v2828_v13 = vadd.f32 %v2826_v7, %v2820_v8  ;;  %v2821_v3 = vadd.f32 %v2815_v12, %v2755_v0 }
 0x406   : > { %v2817_v15 = vpop.f32.mrf.mxu1 }
 0x407   : > { %v2830_v17 = vmax.f32 %v2828_v13, 0.0  ;;  %v2829_v47 = vadd.f32 %v2826_v7, %v2821_v3 }
 0x408   : > { %v2818_v21 = vpop.f32.mrf.mxu1 }
 0x409   : > { %v2832_v22 = vpack.c.bf16 %v2830_v17, %v2830_v17  ;;  %v2831_v23 = vmax.f32 %v2829_v47, 0.0 }
 0x40b   : > { %v2833_v48 = vpack.c.bf16 %v2831_v23, %v2831_v23  ;;  %v2845_v24 = vsel %vm1694_vm3, %v2832_v22, 0 }
 0x40d   : > { %3027 = vmatprep.subr.msk.bf16.mxu0 %vm1694_vm3, %v2833_v48 }
 0x40e   : > { %2865 = vmatpush1.bf16.msra.mxu0 %v2845_v24 }
 0x411   : > { %3028 = vmatmul.mubr.msk.bf16.vlgmr.msra.gmra.mxu0 %vm1690_vm5, %v2834_v25 }
 0x4d1   : > { %v2884_v39 = vpop.f32.mrf.mxu0 }
 0x4d2   : > { %v2885_v30 = vadd.f32 %v2884_v39, %v2839_v29 }
 0x4d3   : > { %v2886_v28 = vpop.f32.mrf.mxu0 }
 0x4d4   : > { %v2887_v35 = vadd.f32 %v2886_v28, %v2839_v29  ;;  %2891 = vst [vmem:[%s352_s12] sm:$0xff] %v2885_v30 }
 0x4d5   : > { %v2888_v31 = vpop.f32.mrf.mxu0 }
 0x4d6   : > { %2892 = vst [vmem:[%s352_s12 + $0x8] sm:$0xff] %v2887_v35 }
 0x4d7   : > { %v2889_v46 = vpop.f32.mrf.mxu0 }
 0x4d8 PF: > { %s19_s30 = sadd.s32 1, %s3066_s30  }
 0x4d9   : > { %p16_p4 = scmp.ge.s32.totalorder %s19_s30, 4  }
 0x4db   :  { %18 = sbr.rel (!%p16_p4) target bundleno = 1 (0x1), region = 89 }

</bundles_post_ra>
